<compile_context>
chip_gen: v7x
topology: tpu7x:2x2x1
jax: 0.10.0
libtpu: 0.0.40
codegen_flags: <defaults>
</compile_context>

<pallas_src>
import functools

import jax
import jax.numpy as jnp
from jax.experimental import pallas as pl
from jax.experimental.pallas import tpu as pltpu


def _round_up(x, m):
    return (x + m - 1) // m * m


def _cdiv(a, b):
    return -(-a // b)


def _crf_kernel(x_ref, w_ref, t_ref, o_ref, cnt_ref, *,
                n_channels, n_quantiles, p_tile, l_tile, n_l, rem, l_total):
    """One grid step = one (batch, P-tile, L-tile) triple.

    x_ref:   (C, l_tile)       input chunk (batch dim squeezed), caller dtype
    w_ref:   (p_tile, C)       projection rows for this P tile (f32, resident over L)
    t_ref:   (p_tile, Q)       per-projection thresholds       (f32, resident over L)
    o_ref:   (p_tile, Q)       output block (batch squeezed), written only at the last L tile
    cnt_ref: (Q, p_tile, 128)  VMEM scratch: per-quantile lane-column partial counts
    """
    C, Q = n_channels, n_quantiles
    l_idx = pl.program_id(2)

    # New (batch, P-tile) slab: zero the lane-partial count accumulators.
    @pl.when(l_idx == 0)
    def _():
        cnt_ref[...] = jnp.zeros_like(cnt_ref)

    # Hoisted lane-broadcasts (JAX does not CSE broadcast_in_dim; do them once
    # per grid step, not once per 128-lane chunk).
    w_cols = [jnp.broadcast_to(w_ref[:, c:c + 1].astype(jnp.float32), (p_tile, 128))
              for c in range(C)]
    t_cols = [jnp.broadcast_to(t_ref[:, q:q + 1], (p_tile, 128)) for q in range(Q)]

    def project_chunk(base):
        # conv1d(kernel=1) for one 128-lane chunk: exact f32 FMA over channels.
        a = w_cols[0] * x_ref[0:1, base:base + 128].astype(jnp.float32)
        for c in range(1, C):
            a = a + w_cols[c] * x_ref[c:c + 1, base:base + 128].astype(jnp.float32)
        return a                                                  # (p_tile, 128) f32

    def accumulate(n_valid):
        # Count (a < t_q) over the first `n_valid` lanes of this tile.  All
        # per-tile work is lane-dense VPU compare/select/add into register
        # accumulators; the VMEM scratch is touched once per (tile, q) and the
        # cross-lane (XLU) reduce is deferred to finalize.
        n_full = n_valid // 128
        tail = n_valid - n_full * 128
        accs = [cnt_ref[q] for q in range(Q)]                     # (p_tile, 128) each
        for j in range(n_full):
            a = project_chunk(j * 128)
            for q in range(Q):
                accs[q] = accs[q] + (a < t_cols[q]).astype(jnp.float32)
        if tail:
            a = project_chunk(n_full * 128)
            lane = jax.lax.broadcasted_iota(jnp.int32, (p_tile, 128), 1)
            a = jnp.where(lane < tail, a, jnp.inf)   # garbage lanes never pass '<'
            for q in range(Q):
                accs[q] = accs[q] + (a < t_cols[q]).astype(jnp.float32)
        for q in range(Q):
            cnt_ref[q] = accs[q]

    if rem == l_tile:
        # L is an exact multiple of l_tile: every tile is full, no masking at all.
        accumulate(l_tile)
    else:
        # Only the final L tile is ragged; all other tiles run the unmasked body.
        @pl.when(l_idx < n_l - 1)
        def _():
            accumulate(l_tile)

        @pl.when(l_idx == n_l - 1)
        def _():
            accumulate(rem)

    # Finalize once per (batch, P-tile): Q cross-lane reduces + narrow stores
    # (negligible: once per batch element, not per tile).
    @pl.when(l_idx == n_l - 1)
    def _():
        inv_l = jnp.float32(1.0 / l_total)
        for q in range(Q):
            o_ref[:, q:q + 1] = jnp.sum(cnt_ref[q], axis=1, keepdims=True) * inv_l


def cumulative_radon_features(x, projections, min_vals, max_vals, n_quantiles,
                              *, l_tile_target=16384, p_tile=None):
    """x: (B, C, L); projections: (P, C, 1); min/max_vals: (P,).  Returns (B, P*Q) f32.

    torch semantics: a = conv1d(x, projections); cdf[b, p, q] = mean_L(a < thr[p, q]);
    thr[p, q] = min[p] + (max[p] - min[p]) * (q + 1) / (Q + 1).

    Note: strict '<' against a threshold is sensitive to low-bit differences in
    the projection; the kernel computes it in exact f32, but a bf16 caller may
    see boundary flips relative to an f32 reference.
    """
    B, C, L = x.shape
    P = projections.shape[0]
    Q = int(n_quantiles)

    w = projections[:, :, 0].astype(jnp.float32)                              # (P, C) tiny
    qfrac = (jnp.arange(1, Q + 1, dtype=jnp.float32) / (Q + 1))[None, :]
    thresholds = (min_vals[:, None].astype(jnp.float32)
                  + (max_vals - min_vals)[:, None].astype(jnp.float32) * qfrac)  # (P, Q)

    # Per-generation VMEM budget (v7x: 64 MiB physical; v5e/v6e: 128 MiB).
    try:
        vmem_cap = int(pltpu.get_tpu_info().vmem_capacity_bytes)
    except Exception:
        vmem_cap = 64 * 1024 * 1024
    vmem_limit = min(vmem_cap * 3 // 4, 100 * 1024 * 1024)

    # L tiling: X is NOT padded or copied in HBM.  The grid covers L with cdiv
    # and the ragged final block is masked in-kernel.  Keep the double-buffered
    # X tile within ~1/4 of the VMEM budget (review: 8K-32K lane tiles).
    itemsize = jnp.dtype(x.dtype).itemsize
    max_lanes = max(128, (vmem_limit // 4) // max(1, 2 * C * itemsize))
    l_tile = max(128, (min(l_tile_target, _round_up(L, 128), max_lanes) // 128) * 128)
    n_l = _cdiv(L, l_tile)
    rem = L - (n_l - 1) * l_tile                                  # valid lanes in last tile

    # P tiling: a "parallel" grid axis (also gives v7x's 2nd TensorCore work
    # when the batch is small).  p_tile is sized so Q accumulators + Q
    # thresholds + C projection columns fit the 64-entry vreg file.
    P8 = _round_up(P, 8)
    if p_tile is None:
        rows8 = max(1, 48 // (2 * Q + C))
        p_tile = min(P8, 8 * rows8)
        if B < 2 and p_tile == P8 and P8 > 8:
            p_tile = _round_up(_cdiv(P8, 2), 8)      # split P so both TCs get work
    p_tile = max(8, _round_up(min(int(p_tile), P8), 8))
    n_p = _cdiv(P, p_tile)
    # TODO(synk): for large P*Q (module defaults P=100, Q=20) keep the per-quantile
    # accumulators in VMEM scratch instead of vregs so p_tile can grow and X is not
    # re-read n_p times.
    # TODO(synk): for large C, compute the per-tile projection with jnp.dot on the
    # MXU instead of the per-channel VPU FMA loop.

    kernel = functools.partial(
        _crf_kernel, n_channels=C, n_quantiles=Q, p_tile=p_tile,
        l_tile=l_tile, n_l=n_l, rem=rem, l_total=L)

    cost = pl.CostEstimate(
        flops=int(2 * B * P * C * L + 2 * B * P * Q * L),
        transcendentals=0,
        bytes_accessed=int(B * C * L * itemsize * n_p
                           + P * C * 4 + P * Q * 4 + B * P * Q * 4))

    cdf = pl.pallas_call(
        kernel,
        out_shape=jax.ShapeDtypeStruct((B, P, Q), jnp.float32),
        grid_spec=pltpu.PrefetchScalarGridSpec(
            num_scalar_prefetch=0,
            grid=(B, n_p, n_l),                                   # L (reduction) axis last
            in_specs=[
                pl.BlockSpec((None, C, l_tile), lambda b, p, l: (b, 0, l)),   # X chunk
                pl.BlockSpec((p_tile, C), lambda b, p, l: (p, 0)),            # W rows (resident)
                pl.BlockSpec((p_tile, Q), lambda b, p, l: (p, 0)),            # thresholds
            ],
            out_specs=pl.BlockSpec((None, p_tile, Q), lambda b, p, l: (b, p, 0)),
            scratch_shapes=[pltpu.VMEM((Q, p_tile, 128), jnp.float32)],
        ),
        compiler_params=pltpu.CompilerParams(
            dimension_semantics=("parallel", "parallel", "arbitrary"),
            vmem_limit_bytes=int(vmem_limit)),
        cost_estimate=cost,
    )(x, w, thresholds)

    # torch: cdf.reshape((B, -1)) on (B, P, Q) — row-major flatten, same as jnp.
    return cdf.reshape(B, P * Q)


# ----------------------------- plain-JAX reference -----------------------------

def _project(x, projections):
    """conv1d(kernel=1): (B, C, L) x (P, C, 1) -> (B, P, L)."""
    return jnp.einsum("pc,bcl->bpl", projections[:, :, 0], x,
                      precision=jax.lax.Precision.HIGHEST)


def _reference_cdf(a, min_vals, max_vals, n_quantiles, shift=0.0):
    """Reference CDF features from projected values a: (B, P, L) -> (B, P*Q)."""
    Q = n_quantiles
    qs = jnp.arange(1, Q + 1, dtype=jnp.float32) / (Q + 1)
    thr = min_vals[:, None] + (max_vals - min_vals)[:, None] * qs[None, :] + shift
    cdf = jnp.mean((a[:, :, None, :] < thr[None, :, :, None]).astype(jnp.float32),
                   axis=-1)
    return cdf.reshape(a.shape[0], -1)


if __name__ == "__main__":
    # Small shapes consistent with the module.  L = 400 = 3*128 + 16 exercises
    # both the multi-L-tile accumulation path and the ragged final tile.
    B, C, L = 2, 4, 400
    n_projections, n_quantiles = 16, 8

    key = jax.random.PRNGKey(0)
    k_x, k_w, k_fit = jax.random.split(key, 3)

    x = jax.random.normal(k_x, (B, C, L), dtype=jnp.float32)
    projections = jax.random.normal(k_w, (n_projections, C, 1), dtype=jnp.float32)

    # Deterministic "fit" (plain-JAX glue mirroring the torch fit()).
    x_fit = jax.random.normal(k_fit, (4, C, L), dtype=jnp.float32)
    a_fit = _project(x_fit, projections)
    a_flat = jnp.transpose(a_fit, (0, 2, 1)).reshape(-1, n_projections)
    min_vals = jnp.quantile(a_flat, 0.01, axis=0)
    max_vals = jnp.quantile(a_flat, 0.99, axis=0)

    def check(x_in, **cfg):
        out = jax.block_until_ready(
            cumulative_radon_features(x_in, projections, min_vals, max_vals,
                                      n_quantiles, **cfg))
        assert out.shape == (x_in.shape[0], n_projections * n_quantiles)
        # Strict '<' can legitimately flip for values landing (sub-1e-5) on a
        # threshold, so compare against a reference bracket with thresholds
        # shifted by +/- eps instead of a raw allclose.
        eps = 1e-3
        a_ref = _project(x_in, projections)
        lo = _reference_cdf(a_ref, min_vals, max_vals, n_quantiles, shift=-eps)
        hi = _reference_cdf(a_ref, min_vals, max_vals, n_quantiles, shift=+eps)
        ok = jnp.all((out >= lo - 1e-6) & (out <= hi + 1e-6))
        assert bool(ok), f"mismatch vs reference bracket for config {cfg}"

    # 1) multiple L tiles + ragged final tile (400 = 3*128 + 16)
    check(x, l_tile_target=128)
    # 2) split-P parallel grid axis (n_p = 2)
    check(x, l_tile_target=128, p_tile=8)
    # 3) default tile sizing (single ragged L tile at this small L)
    check(x)
    # 4) L an exact multiple of the tile: unmasked fast path only
    check(x[:, :, :384], l_tile_target=128)

    print("KERNEL_OK")
</pallas_src>

<mosaic_0001>
module attributes {stable_mosaic.version = 11 : i64} {
  func.func @_crf_kernel(%arg0: i32, %arg1: i32, %arg2: i32, %arg3: memref<1x4x128xf32, #tpu.memory_space<vmem>>, %arg4: memref<16x4xf32, #tpu.memory_space<vmem>>, %arg5: memref<16x8xf32, #tpu.memory_space<vmem>>, %arg6: memref<1x16x8xf32, #tpu.memory_space<vmem>>, %arg7: memref<8x16x128xf32, #tpu.memory_space<vmem>>) attributes {dimension_semantics = [#tpu.dimension_semantics<parallel>, #tpu.dimension_semantics<parallel>, #tpu.dimension_semantics<arbitrary>], iteration_bounds = array<i64: 2, 1, 4>, scalar_prefetch = 0 : i64, scratch_operands = 1 : i64, tpu.core_type = #tpu.core_type<tc>, window_params = [{transform_indices = @transform_0, window_bounds = array<i64: 1, 4, 128>}, {transform_indices = @transform_1, window_bounds = array<i64: 16, 4>}, {transform_indices = @transform_2, window_bounds = array<i64: 16, 8>}, {transform_indices = @transform_3, window_bounds = array<i64: 1, 16, 8>}]} {
    %c0_i32 = arith.constant 0 : i32
    %0 = arith.cmpi eq, %arg2, %c0_i32 : i32
    %1 = arith.extui %0 : i1 to i32
    %c0_i32_0 = arith.constant 0 : i32
    %2 = arith.cmpi ne, %1, %c0_i32_0 : i32
    scf.if %2 {
      %cst = arith.constant 0.000000e+00 : f32
      %48 = vector.broadcast %cst : f32 to vector<8x16x128xf32>
      %c0_22 = arith.constant 0 : index
      %c0_23 = arith.constant 0 : index
      %c0_24 = arith.constant 0 : index
      %49 = vector.load %arg7[%c0_22, %c0_23, %c0_24] : memref<8x16x128xf32, #tpu.memory_space<vmem>>, vector<8x16x128xf32>
      tpu.vector_store %arg7[%c0_22, %c0_23, %c0_24], %48 {strides = array<i32>} : memref<8x16x128xf32, #tpu.memory_space<vmem>>, vector<8x16x128xf32>,
    } else {
    }
    %c0 = arith.constant 0 : index
    %c0_1 = arith.constant 0 : index
    %3 = vector.load %arg4[%c0, %c0_1] : memref<16x4xf32, #tpu.memory_space<vmem>>, vector<16x1xf32>
    %4 = vector.shape_cast %3 : vector<16x1xf32> to vector<16x1xf32>
    %5 = vector.broadcast %4 : vector<16x1xf32> to vector<16x128xf32>
    %c0_2 = arith.constant 0 : index
    %c1 = arith.constant 1 : index
    %6 = vector.load %arg4[%c0_2, %c1] : memref<16x4xf32, #tpu.memory_space<vmem>>, vector<16x1xf32>
    %7 = vector.shape_cast %6 : vector<16x1xf32> to vector<16x1xf32>
    %8 = vector.broadcast %7 : vector<16x1xf32> to vector<16x128xf32>
    %c0_3 = arith.constant 0 : index
    %c2 = arith.constant 2 : index
    %9 = vector.load %arg4[%c0_3, %c2] : memref<16x4xf32, #tpu.memory_space<vmem>>, vector<16x1xf32>
    %10 = vector.shape_cast %9 : vector<16x1xf32> to vector<16x1xf32>
    %11 = vector.broadcast %10 : vector<16x1xf32> to vector<16x128xf32>
    %c0_4 = arith.constant 0 : index
    %c3 = arith.constant 3 : index
    %12 = vector.load %arg4[%c0_4, %c3] : memref<16x4xf32, #tpu.memory_space<vmem>>, vector<16x1xf32>
    %13 = vector.shape_cast %12 : vector<16x1xf32> to vector<16x1xf32>
    %14 = vector.broadcast %13 : vector<16x1xf32> to vector<16x128xf32>
    %c0_5 = arith.constant 0 : index
    %c0_6 = arith.constant 0 : index
    %15 = vector.load %arg5[%c0_5, %c0_6] : memref<16x8xf32, #tpu.memory_space<vmem>>, vector<16x1xf32>
    %16 = vector.shape_cast %15 : vector<16x1xf32> to vector<16x1xf32>
    %17 = vector.broadcast %16 : vector<16x1xf32> to vector<16x128xf32>
    %c0_7 = arith.constant 0 : index
    %c1_8 = arith.constant 1 : index
    %18 = vector.load %arg5[%c0_7, %c1_8] : memref<16x8xf32, #tpu.memory_space<vmem>>, vector<16x1xf32>
    %19 = vector.shape_cast %18 : vector<16x1xf32> to vector<16x1xf32>
    %20 = vector.broadcast %19 : vector<16x1xf32> to vector<16x128xf32>
    %c0_9 = arith.constant 0 : index
    %c2_10 = arith.constant 2 : index
    %21 = vector.load %arg5[%c0_9, %c2_10] : memref<16x8xf32, #tpu.memory_space<vmem>>, vector<16x1xf32>
    %22 = vector.shape_cast %21 : vector<16x1xf32> to vector<16x1xf32>
    %23 = vector.broadcast %22 : vector<16x1xf32> to vector<16x128xf32>
    %c0_11 = arith.constant 0 : index
    %c3_12 = arith.constant 3 : index
    %24 = vector.load %arg5[%c0_11, %c3_12] : memref<16x8xf32, #tpu.memory_space<vmem>>, vector<16x1xf32>
    %25 = vector.shape_cast %24 : vector<16x1xf32> to vector<16x1xf32>
    %26 = vector.broadcast %25 : vector<16x1xf32> to vector<16x128xf32>
    %c0_13 = arith.constant 0 : index
    %c4 = arith.constant 4 : index
    %27 = vector.load %arg5[%c0_13, %c4] : memref<16x8xf32, #tpu.memory_space<vmem>>, vector<16x1xf32>
    %28 = vector.shape_cast %27 : vector<16x1xf32> to vector<16x1xf32>
    %29 = vector.broadcast %28 : vector<16x1xf32> to vector<16x128xf32>
    %c0_14 = arith.constant 0 : index
    %c5 = arith.constant 5 : index
    %30 = vector.load %arg5[%c0_14, %c5] : memref<16x8xf32, #tpu.memory_space<vmem>>, vector<16x1xf32>
    %31 = vector.shape_cast %30 : vector<16x1xf32> to vector<16x1xf32>
    %32 = vector.broadcast %31 : vector<16x1xf32> to vector<16x128xf32>
    %c0_15 = arith.constant 0 : index
    %c6 = arith.constant 6 : index
    %33 = vector.load %arg5[%c0_15, %c6] : memref<16x8xf32, #tpu.memory_space<vmem>>, vector<16x1xf32>
    %34 = vector.shape_cast %33 : vector<16x1xf32> to vector<16x1xf32>
    %35 = vector.broadcast %34 : vector<16x1xf32> to vector<16x128xf32>
    %c0_16 = arith.constant 0 : index
    %c7 = arith.constant 7 : index
    %36 = vector.load %arg5[%c0_16, %c7] : memref<16x8xf32, #tpu.memory_space<vmem>>, vector<16x1xf32>
    %37 = vector.shape_cast %36 : vector<16x1xf32> to vector<16x1xf32>
    %38 = vector.broadcast %37 : vector<16x1xf32> to vector<16x128xf32>
    %c3_i32 = arith.constant 3 : i32
    %39 = arith.cmpi slt, %arg2, %c3_i32 : i32
    %40 = arith.extui %39 : i1 to i32
    %c0_i32_17 = arith.constant 0 : i32
    %41 = arith.cmpi ne, %40, %c0_i32_17 : i32
    scf.if %41 {
      %c0_22 = arith.constant 0 : index
      %c0_23 = arith.constant 0 : index
      %c0_24 = arith.constant 0 : index
      %48 = vector.load %arg7[%c0_22, %c0_23, %c0_24] : memref<8x16x128xf32, #tpu.memory_space<vmem>>, vector<1x16x128xf32>
      %49 = vector.shape_cast %48 : vector<1x16x128xf32> to vector<16x128xf32>
      %c1_25 = arith.constant 1 : index
      %c0_26 = arith.constant 0 : index
      %c0_27 = arith.constant 0 : index
      %50 = vector.load %arg7[%c1_25, %c0_26, %c0_27] : memref<8x16x128xf32, #tpu.memory_space<vmem>>, vector<1x16x128xf32>
      %51 = vector.shape_cast %50 : vector<1x16x128xf32> to vector<16x128xf32>
      %c2_28 = arith.constant 2 : index
      %c0_29 = arith.constant 0 : index
      %c0_30 = arith.constant 0 : index
      %52 = vector.load %arg7[%c2_28, %c0_29, %c0_30] : memref<8x16x128xf32, #tpu.memory_space<vmem>>, vector<1x16x128xf32>
      %53 = vector.shape_cast %52 : vector<1x16x128xf32> to vector<16x128xf32>
      %c3_31 = arith.constant 3 : index
      %c0_32 = arith.constant 0 : index
      %c0_33 = arith.constant 0 : index
      %54 = vector.load %arg7[%c3_31, %c0_32, %c0_33] : memref<8x16x128xf32, #tpu.memory_space<vmem>>, vector<1x16x128xf32>
      %55 = vector.shape_cast %54 : vector<1x16x128xf32> to vector<16x128xf32>
      %c4_34 = arith.constant 4 : index
      %c0_35 = arith.constant 0 : index
      %c0_36 = arith.constant 0 : index
      %56 = vector.load %arg7[%c4_34, %c0_35, %c0_36] : memref<8x16x128xf32, #tpu.memory_space<vmem>>, vector<1x16x128xf32>
      %57 = vector.shape_cast %56 : vector<1x16x128xf32> to vector<16x128xf32>
      %c5_37 = arith.constant 5 : index
      %c0_38 = arith.constant 0 : index
      %c0_39 = arith.constant 0 : index
      %58 = vector.load %arg7[%c5_37, %c0_38, %c0_39] : memref<8x16x128xf32, #tpu.memory_space<vmem>>, vector<1x16x128xf32>
      %59 = vector.shape_cast %58 : vector<1x16x128xf32> to vector<16x128xf32>
      %c6_40 = arith.constant 6 : index
      %c0_41 = arith.constant 0 : index
      %c0_42 = arith.constant 0 : index
      %60 = vector.load %arg7[%c6_40, %c0_41, %c0_42] : memref<8x16x128xf32, #tpu.memory_space<vmem>>, vector<1x16x128xf32>
      %61 = vector.shape_cast %60 : vector<1x16x128xf32> to vector<16x128xf32>
      %c7_43 = arith.constant 7 : index
      %c0_44 = arith.constant 0 : index
      %c0_45 = arith.constant 0 : index
      %62 = vector.load %arg7[%c7_43, %c0_44, %c0_45] : memref<8x16x128xf32, #tpu.memory_space<vmem>>, vector<1x16x128xf32>
      %63 = vector.shape_cast %62 : vector<1x16x128xf32> to vector<16x128xf32>
      %c0_46 = arith.constant 0 : index
      %c0_47 = arith.constant 0 : index
      %c0_48 = arith.constant 0 : index
      %64 = vector.load %arg3[%c0_46, %c0_47, %c0_48] : memref<1x4x128xf32, #tpu.memory_space<vmem>>, vector<1x1x128xf32>
      %65 = vector.shape_cast %64 : vector<1x1x128xf32> to vector<1x128xf32>
      %66 = vector.broadcast %65 : vector<1x128xf32> to vector<16x128xf32>
      %67 = arith.mulf %5, %66 : vector<16x128xf32>
      %c0_49 = arith.constant 0 : index
      %c1_50 = arith.constant 1 : index
      %c0_51 = arith.constant 0 : index
      %68 = vector.load %arg3[%c0_49, %c1_50, %c0_51] : memref<1x4x128xf32, #tpu.memory_space<vmem>>, vector<1x1x128xf32>
      %69 = vector.shape_cast %68 : vector<1x1x128xf32> to vector<1x128xf32>
      %70 = vector.broadcast %69 : vector<1x128xf32> to vector<16x128xf32>
      %71 = arith.mulf %8, %70 : vector<16x128xf32>
      %72 = arith.addf %67, %71 : vector<16x128xf32>
      %c0_52 = arith.constant 0 : index
      %c2_53 = arith.constant 2 : index
      %c0_54 = arith.constant 0 : index
      %73 = vector.load %arg3[%c0_52, %c2_53, %c0_54] : memref<1x4x128xf32, #tpu.memory_space<vmem>>, vector<1x1x128xf32>
      %74 = vector.shape_cast %73 : vector<1x1x128xf32> to vector<1x128xf32>
      %75 = vector.broadcast %74 : vector<1x128xf32> to vector<16x128xf32>
      %76 = arith.mulf %11, %75 : vector<16x128xf32>
      %77 = arith.addf %72, %76 : vector<16x128xf32>
      %c0_55 = arith.constant 0 : index
      %c3_56 = arith.constant 3 : index
      %c0_57 = arith.constant 0 : index
      %78 = vector.load %arg3[%c0_55, %c3_56, %c0_57] : memref<1x4x128xf32, #tpu.memory_space<vmem>>, vector<1x1x128xf32>
      %79 = vector.shape_cast %78 : vector<1x1x128xf32> to vector<1x128xf32>
      %80 = vector.broadcast %79 : vector<1x128xf32> to vector<16x128xf32>
      %81 = arith.mulf %14, %80 : vector<16x128xf32>
      %82 = arith.addf %77, %81 : vector<16x128xf32>
      %83 = arith.cmpf olt, %82, %17 : vector<16x128xf32>
      %84 = arith.extui %83 : vector<16x128xi1> to vector<16x128xi32>
      %85 = arith.sitofp %84 : vector<16x128xi32> to vector<16x128xf32>
      %86 = arith.addf %49, %85 : vector<16x128xf32>
      %87 = arith.cmpf olt, %82, %20 : vector<16x128xf32>
      %88 = arith.extui %87 : vector<16x128xi1> to vector<16x128xi32>
      %89 = arith.sitofp %88 : vector<16x128xi32> to vector<16x128xf32>
      %90 = arith.addf %51, %89 : vector<16x128xf32>
      %91 = arith.cmpf olt, %82, %23 : vector<16x128xf32>
      %92 = arith.extui %91 : vector<16x128xi1> to vector<16x128xi32>
      %93 = arith.sitofp %92 : vector<16x128xi32> to vector<16x128xf32>
      %94 = arith.addf %53, %93 : vector<16x128xf32>
      %95 = arith.cmpf olt, %82, %26 : vector<16x128xf32>
      %96 = arith.extui %95 : vector<16x128xi1> to vector<16x128xi32>
      %97 = arith.sitofp %96 : vector<16x128xi32> to vector<16x128xf32>
      %98 = arith.addf %55, %97 : vector<16x128xf32>
      %99 = arith.cmpf olt, %82, %29 : vector<16x128xf32>
      %100 = arith.extui %99 : vector<16x128xi1> to vector<16x128xi32>
      %101 = arith.sitofp %100 : vector<16x128xi32> to vector<16x128xf32>
      %102 = arith.addf %57, %101 : vector<16x128xf32>
      %103 = arith.cmpf olt, %82, %32 : vector<16x128xf32>
      %104 = arith.extui %103 : vector<16x128xi1> to vector<16x128xi32>
      %105 = arith.sitofp %104 : vector<16x128xi32> to vector<16x128xf32>
      %106 = arith.addf %59, %105 : vector<16x128xf32>
      %107 = arith.cmpf olt, %82, %35 : vector<16x128xf32>
      %108 = arith.extui %107 : vector<16x128xi1> to vector<16x128xi32>
      %109 = arith.sitofp %108 : vector<16x128xi32> to vector<16x128xf32>
      %110 = arith.addf %61, %109 : vector<16x128xf32>
      %111 = arith.cmpf olt, %82, %38 : vector<16x128xf32>
      %112 = arith.extui %111 : vector<16x128xi1> to vector<16x128xi32>
      %113 = arith.sitofp %112 : vector<16x128xi32> to vector<16x128xf32>
      %114 = arith.addf %63, %113 : vector<16x128xf32>
      %c0_58 = arith.constant 0 : index
      %c0_59 = arith.constant 0 : index
      %c0_60 = arith.constant 0 : index
      %115 = vector.load %arg7[%c0_58, %c0_59, %c0_60] : memref<8x16x128xf32, #tpu.memory_space<vmem>>, vector<1x16x128xf32>
      %116 = vector.shape_cast %115 : vector<1x16x128xf32> to vector<16x128xf32>
      %117 = vector.shape_cast %86 : vector<16x128xf32> to vector<1x16x128xf32>
      tpu.vector_store %arg7[%c0_58, %c0_59, %c0_60], %117 {strides = array<i32>} : memref<8x16x128xf32, #tpu.memory_space<vmem>>, vector<1x16x128xf32>,
      %c1_61 = arith.constant 1 : index
      %c0_62 = arith.constant 0 : index
      %c0_63 = arith.constant 0 : index
      %118 = vector.load %arg7[%c1_61, %c0_62, %c0_63] : memref<8x16x128xf32, #tpu.memory_space<vmem>>, vector<1x16x128xf32>
      %119 = vector.shape_cast %118 : vector<1x16x128xf32> to vector<16x128xf32>
      %120 = vector.shape_cast %90 : vector<16x128xf32> to vector<1x16x128xf32>
      tpu.vector_store %arg7[%c1_61, %c0_62, %c0_63], %120 {strides = array<i32>} : memref<8x16x128xf32, #tpu.memory_space<vmem>>, vector<1x16x128xf32>,
      %c2_64 = arith.constant 2 : index
      %c0_65 = arith.constant 0 : index
      %c0_66 = arith.constant 0 : index
      %121 = vector.load %arg7[%c2_64, %c0_65, %c0_66] : memref<8x16x128xf32, #tpu.memory_space<vmem>>, vector<1x16x128xf32>
      %122 = vector.shape_cast %121 : vector<1x16x128xf32> to vector<16x128xf32>
      %123 = vector.shape_cast %94 : vector<16x128xf32> to vector<1x16x128xf32>
      tpu.vector_store %arg7[%c2_64, %c0_65, %c0_66], %123 {strides = array<i32>} : memref<8x16x128xf32, #tpu.memory_space<vmem>>, vector<1x16x128xf32>,
      %c3_67 = arith.constant 3 : index
      %c0_68 = arith.constant 0 : index
      %c0_69 = arith.constant 0 : index
      %124 = vector.load %arg7[%c3_67, %c0_68, %c0_69] : memref<8x16x128xf32, #tpu.memory_space<vmem>>, vector<1x16x128xf32>
      %125 = vector.shape_cast %124 : vector<1x16x128xf32> to vector<16x128xf32>
      %126 = vector.shape_cast %98 : vector<16x128xf32> to vector<1x16x128xf32>
      tpu.vector_store %arg7[%c3_67, %c0_68, %c0_69], %126 {strides = array<i32>} : memref<8x16x128xf32, #tpu.memory_space<vmem>>, vector<1x16x128xf32>,
      %c4_70 = arith.constant 4 : index
      %c0_71 = arith.constant 0 : index
      %c0_72 = arith.constant 0 : index
      %127 = vector.load %arg7[%c4_70, %c0_71, %c0_72] : memref<8x16x128xf32, #tpu.memory_space<vmem>>, vector<1x16x128xf32>
      %128 = vector.shape_cast %127 : vector<1x16x128xf32> to vector<16x128xf32>
      %129 = vector.shape_cast %102 : vector<16x128xf32> to vector<1x16x128xf32>
      tpu.vector_store %arg7[%c4_70, %c0_71, %c0_72], %129 {strides = array<i32>} : memref<8x16x128xf32, #tpu.memory_space<vmem>>, vector<1x16x128xf32>,
      %c5_73 = arith.constant 5 : index
      %c0_74 = arith.constant 0 : index
      %c0_75 = arith.constant 0 : index
      %130 = vector.load %arg7[%c5_73, %c0_74, %c0_75] : memref<8x16x128xf32, #tpu.memory_space<vmem>>, vector<1x16x128xf32>
      %131 = vector.shape_cast %130 : vector<1x16x128xf32> to vector<16x128xf32>
      %132 = vector.shape_cast %106 : vector<16x128xf32> to vector<1x16x128xf32>
      tpu.vector_store %arg7[%c5_73, %c0_74, %c0_75], %132 {strides = array<i32>} : memref<8x16x128xf32, #tpu.memory_space<vmem>>, vector<1x16x128xf32>,
      %c6_76 = arith.constant 6 : index
      %c0_77 = arith.constant 0 : index
      %c0_78 = arith.constant 0 : index
      %133 = vector.load %arg7[%c6_76, %c0_77, %c0_78] : memref<8x16x128xf32, #tpu.memory_space<vmem>>, vector<1x16x128xf32>
      %134 = vector.shape_cast %133 : vector<1x16x128xf32> to vector<16x128xf32>
      %135 = vector.shape_cast %110 : vector<16x128xf32> to vector<1x16x128xf32>
      tpu.vector_store %arg7[%c6_76, %c0_77, %c0_78], %135 {strides = array<i32>} : memref<8x16x128xf32, #tpu.memory_space<vmem>>, vector<1x16x128xf32>,
      %c7_79 = arith.constant 7 : index
      %c0_80 = arith.constant 0 : index
      %c0_81 = arith.constant 0 : index
      %136 = vector.load %arg7[%c7_79, %c0_80, %c0_81] : memref<8x16x128xf32, #tpu.memory_space<vmem>>, vector<1x16x128xf32>
      %137 = vector.shape_cast %136 : vector<1x16x128xf32> to vector<16x128xf32>
      %138 = vector.shape_cast %114 : vector<16x128xf32> to vector<1x16x128xf32>
      tpu.vector_store %arg7[%c7_79, %c0_80, %c0_81], %138 {strides = array<i32>} : memref<8x16x128xf32, #tpu.memory_space<vmem>>, vector<1x16x128xf32>,
    } else {
    }
    %c3_i32_18 = arith.constant 3 : i32
    %42 = arith.cmpi eq, %arg2, %c3_i32_18 : i32
    %43 = arith.extui %42 : i1 to i32
    %c0_i32_19 = arith.constant 0 : i32
    %44 = arith.cmpi ne, %43, %c0_i32_19 : i32
    scf.if %44 {
      %c0_22 = arith.constant 0 : index
      %c0_23 = arith.constant 0 : index
      %c0_24 = arith.constant 0 : index
      %48 = vector.load %arg7[%c0_22, %c0_23, %c0_24] : memref<8x16x128xf32, #tpu.memory_space<vmem>>, vector<1x16x128xf32>
      %49 = vector.shape_cast %48 : vector<1x16x128xf32> to vector<16x128xf32>
      %c1_25 = arith.constant 1 : index
      %c0_26 = arith.constant 0 : index
      %c0_27 = arith.constant 0 : index
      %50 = vector.load %arg7[%c1_25, %c0_26, %c0_27] : memref<8x16x128xf32, #tpu.memory_space<vmem>>, vector<1x16x128xf32>
      %51 = vector.shape_cast %50 : vector<1x16x128xf32> to vector<16x128xf32>
      %c2_28 = arith.constant 2 : index
      %c0_29 = arith.constant 0 : index
      %c0_30 = arith.constant 0 : index
      %52 = vector.load %arg7[%c2_28, %c0_29, %c0_30] : memref<8x16x128xf32, #tpu.memory_space<vmem>>, vector<1x16x128xf32>
      %53 = vector.shape_cast %52 : vector<1x16x128xf32> to vector<16x128xf32>
      %c3_31 = arith.constant 3 : index
      %c0_32 = arith.constant 0 : index
      %c0_33 = arith.constant 0 : index
      %54 = vector.load %arg7[%c3_31, %c0_32, %c0_33] : memref<8x16x128xf32, #tpu.memory_space<vmem>>, vector<1x16x128xf32>
      %55 = vector.shape_cast %54 : vector<1x16x128xf32> to vector<16x128xf32>
      %c4_34 = arith.constant 4 : index
      %c0_35 = arith.constant 0 : index
      %c0_36 = arith.constant 0 : index
      %56 = vector.load %arg7[%c4_34, %c0_35, %c0_36] : memref<8x16x128xf32, #tpu.memory_space<vmem>>, vector<1x16x128xf32>
      %57 = vector.shape_cast %56 : vector<1x16x128xf32> to vector<16x128xf32>
      %c5_37 = arith.constant 5 : index
      %c0_38 = arith.constant 0 : index
      %c0_39 = arith.constant 0 : index
      %58 = vector.load %arg7[%c5_37, %c0_38, %c0_39] : memref<8x16x128xf32, #tpu.memory_space<vmem>>, vector<1x16x128xf32>
      %59 = vector.shape_cast %58 : vector<1x16x128xf32> to vector<16x128xf32>
      %c6_40 = arith.constant 6 : index
      %c0_41 = arith.constant 0 : index
      %c0_42 = arith.constant 0 : index
      %60 = vector.load %arg7[%c6_40, %c0_41, %c0_42] : memref<8x16x128xf32, #tpu.memory_space<vmem>>, vector<1x16x128xf32>
      %61 = vector.shape_cast %60 : vector<1x16x128xf32> to vector<16x128xf32>
      %c7_43 = arith.constant 7 : index
      %c0_44 = arith.constant 0 : index
      %c0_45 = arith.constant 0 : index
      %62 = vector.load %arg7[%c7_43, %c0_44, %c0_45] : memref<8x16x128xf32, #tpu.memory_space<vmem>>, vector<1x16x128xf32>
      %63 = vector.shape_cast %62 : vector<1x16x128xf32> to vector<16x128xf32>
      %c0_46 = arith.constant 0 : index
      %c0_47 = arith.constant 0 : index
      %c0_48 = arith.constant 0 : index
      %64 = vector.load %arg3[%c0_46, %c0_47, %c0_48] : memref<1x4x128xf32, #tpu.memory_space<vmem>>, vector<1x1x128xf32>
      %65 = vector.shape_cast %64 : vector<1x1x128xf32> to vector<1x128xf32>
      %66 = vector.broadcast %65 : vector<1x128xf32> to vector<16x128xf32>
      %67 = arith.mulf %5, %66 : vector<16x128xf32>
      %c0_49 = arith.constant 0 : index
      %c1_50 = arith.constant 1 : index
      %c0_51 = arith.constant 0 : index
      %68 = vector.load %arg3[%c0_49, %c1_50, %c0_51] : memref<1x4x128xf32, #tpu.memory_space<vmem>>, vector<1x1x128xf32>
      %69 = vector.shape_cast %68 : vector<1x1x128xf32> to vector<1x128xf32>
      %70 = vector.broadcast %69 : vector<1x128xf32> to vector<16x128xf32>
      %71 = arith.mulf %8, %70 : vector<16x128xf32>
      %72 = arith.addf %67, %71 : vector<16x128xf32>
      %c0_52 = arith.constant 0 : index
      %c2_53 = arith.constant 2 : index
      %c0_54 = arith.constant 0 : index
      %73 = vector.load %arg3[%c0_52, %c2_53, %c0_54] : memref<1x4x128xf32, #tpu.memory_space<vmem>>, vector<1x1x128xf32>
      %74 = vector.shape_cast %73 : vector<1x1x128xf32> to vector<1x128xf32>
      %75 = vector.broadcast %74 : vector<1x128xf32> to vector<16x128xf32>
      %76 = arith.mulf %11, %75 : vector<16x128xf32>
      %77 = arith.addf %72, %76 : vector<16x128xf32>
      %c0_55 = arith.constant 0 : index
      %c3_56 = arith.constant 3 : index
      %c0_57 = arith.constant 0 : index
      %78 = vector.load %arg3[%c0_55, %c3_56, %c0_57] : memref<1x4x128xf32, #tpu.memory_space<vmem>>, vector<1x1x128xf32>
      %79 = vector.shape_cast %78 : vector<1x1x128xf32> to vector<1x128xf32>
      %80 = vector.broadcast %79 : vector<1x128xf32> to vector<16x128xf32>
      %81 = arith.mulf %14, %80 : vector<16x128xf32>
      %82 = arith.addf %77, %81 : vector<16x128xf32>
      %83 = tpu.iota {dimensions = array<i32: 1>} : vector<16x128xi32>
      %c16_i32 = arith.constant 16 : i32
      %84 = vector.broadcast %c16_i32 : i32 to vector<16x128xi32>
      %85 = arith.cmpi slt, %83, %84 : vector<16x128xi32>
      %cst = arith.constant 0x7F800000 : f32
      %86 = vector.broadcast %cst : f32 to vector<16x128xf32>
      %87 = arith.select %85, %82, %86 : vector<16x128xi1>, vector<16x128xf32>
      %88 = arith.cmpf olt, %87, %17 : vector<16x128xf32>
      %89 = arith.extui %88 : vector<16x128xi1> to vector<16x128xi32>
      %90 = arith.sitofp %89 : vector<16x128xi32> to vector<16x128xf32>
      %91 = arith.addf %49, %90 : vector<16x128xf32>
      %92 = arith.cmpf olt, %87, %20 : vector<16x128xf32>
      %93 = arith.extui %92 : vector<16x128xi1> to vector<16x128xi32>
      %94 = arith.sitofp %93 : vector<16x128xi32> to vector<16x128xf32>
      %95 = arith.addf %51, %94 : vector<16x128xf32>
      %96 = arith.cmpf olt, %87, %23 : vector<16x128xf32>
      %97 = arith.extui %96 : vector<16x128xi1> to vector<16x128xi32>
      %98 = arith.sitofp %97 : vector<16x128xi32> to vector<16x128xf32>
      %99 = arith.addf %53, %98 : vector<16x128xf32>
      %100 = arith.cmpf olt, %87, %26 : vector<16x128xf32>
      %101 = arith.extui %100 : vector<16x128xi1> to vector<16x128xi32>
      %102 = arith.sitofp %101 : vector<16x128xi32> to vector<16x128xf32>
      %103 = arith.addf %55, %102 : vector<16x128xf32>
      %104 = arith.cmpf olt, %87, %29 : vector<16x128xf32>
      %105 = arith.extui %104 : vector<16x128xi1> to vector<16x128xi32>
      %106 = arith.sitofp %105 : vector<16x128xi32> to vector<16x128xf32>
      %107 = arith.addf %57, %106 : vector<16x128xf32>
      %108 = arith.cmpf olt, %87, %32 : vector<16x128xf32>
      %109 = arith.extui %108 : vector<16x128xi1> to vector<16x128xi32>
      %110 = arith.sitofp %109 : vector<16x128xi32> to vector<16x128xf32>
      %111 = arith.addf %59, %110 : vector<16x128xf32>
      %112 = arith.cmpf olt, %87, %35 : vector<16x128xf32>
      %113 = arith.extui %112 : vector<16x128xi1> to vector<16x128xi32>
      %114 = arith.sitofp %113 : vector<16x128xi32> to vector<16x128xf32>
      %115 = arith.addf %61, %114 : vector<16x128xf32>
      %116 = arith.cmpf olt, %87, %38 : vector<16x128xf32>
      %117 = arith.extui %116 : vector<16x128xi1> to vector<16x128xi32>
      %118 = arith.sitofp %117 : vector<16x128xi32> to vector<16x128xf32>
      %119 = arith.addf %63, %118 : vector<16x128xf32>
      %c0_58 = arith.constant 0 : index
      %c0_59 = arith.constant 0 : index
      %c0_60 = arith.constant 0 : index
      %120 = vector.load %arg7[%c0_58, %c0_59, %c0_60] : memref<8x16x128xf32, #tpu.memory_space<vmem>>, vector<1x16x128xf32>
      %121 = vector.shape_cast %120 : vector<1x16x128xf32> to vector<16x128xf32>
      %122 = vector.shape_cast %91 : vector<16x128xf32> to vector<1x16x128xf32>
      tpu.vector_store %arg7[%c0_58, %c0_59, %c0_60], %122 {strides = array<i32>} : memref<8x16x128xf32, #tpu.memory_space<vmem>>, vector<1x16x128xf32>,
      %c1_61 = arith.constant 1 : index
      %c0_62 = arith.constant 0 : index
      %c0_63 = arith.constant 0 : index
      %123 = vector.load %arg7[%c1_61, %c0_62, %c0_63] : memref<8x16x128xf32, #tpu.memory_space<vmem>>, vector<1x16x128xf32>
      %124 = vector.shape_cast %123 : vector<1x16x128xf32> to vector<16x128xf32>
      %125 = vector.shape_cast %95 : vector<16x128xf32> to vector<1x16x128xf32>
      tpu.vector_store %arg7[%c1_61, %c0_62, %c0_63], %125 {strides = array<i32>} : memref<8x16x128xf32, #tpu.memory_space<vmem>>, vector<1x16x128xf32>,
      %c2_64 = arith.constant 2 : index
      %c0_65 = arith.constant 0 : index
      %c0_66 = arith.constant 0 : index
      %126 = vector.load %arg7[%c2_64, %c0_65, %c0_66] : memref<8x16x128xf32, #tpu.memory_space<vmem>>, vector<1x16x128xf32>
      %127 = vector.shape_cast %126 : vector<1x16x128xf32> to vector<16x128xf32>
      %128 = vector.shape_cast %99 : vector<16x128xf32> to vector<1x16x128xf32>
      tpu.vector_store %arg7[%c2_64, %c0_65, %c0_66], %128 {strides = array<i32>} : memref<8x16x128xf32, #tpu.memory_space<vmem>>, vector<1x16x128xf32>,
      %c3_67 = arith.constant 3 : index
      %c0_68 = arith.constant 0 : index
      %c0_69 = arith.constant 0 : index
      %129 = vector.load %arg7[%c3_67, %c0_68, %c0_69] : memref<8x16x128xf32, #tpu.memory_space<vmem>>, vector<1x16x128xf32>
      %130 = vector.shape_cast %129 : vector<1x16x128xf32> to vector<16x128xf32>
      %131 = vector.shape_cast %103 : vector<16x128xf32> to vector<1x16x128xf32>
      tpu.vector_store %arg7[%c3_67, %c0_68, %c0_69], %131 {strides = array<i32>} : memref<8x16x128xf32, #tpu.memory_space<vmem>>, vector<1x16x128xf32>,
      %c4_70 = arith.constant 4 : index
      %c0_71 = arith.constant 0 : index
      %c0_72 = arith.constant 0 : index
      %132 = vector.load %arg7[%c4_70, %c0_71, %c0_72] : memref<8x16x128xf32, #tpu.memory_space<vmem>>, vector<1x16x128xf32>
      %133 = vector.shape_cast %132 : vector<1x16x128xf32> to vector<16x128xf32>
      %134 = vector.shape_cast %107 : vector<16x128xf32> to vector<1x16x128xf32>
      tpu.vector_store %arg7[%c4_70, %c0_71, %c0_72], %134 {strides = array<i32>} : memref<8x16x128xf32, #tpu.memory_space<vmem>>, vector<1x16x128xf32>,
      %c5_73 = arith.constant 5 : index
      %c0_74 = arith.constant 0 : index
      %c0_75 = arith.constant 0 : index
      %135 = vector.load %arg7[%c5_73, %c0_74, %c0_75] : memref<8x16x128xf32, #tpu.memory_space<vmem>>, vector<1x16x128xf32>
      %136 = vector.shape_cast %135 : vector<1x16x128xf32> to vector<16x128xf32>
      %137 = vector.shape_cast %111 : vector<16x128xf32> to vector<1x16x128xf32>
      tpu.vector_store %arg7[%c5_73, %c0_74, %c0_75], %137 {strides = array<i32>} : memref<8x16x128xf32, #tpu.memory_space<vmem>>, vector<1x16x128xf32>,
      %c6_76 = arith.constant 6 : index
      %c0_77 = arith.constant 0 : index
      %c0_78 = arith.constant 0 : index
      %138 = vector.load %arg7[%c6_76, %c0_77, %c0_78] : memref<8x16x128xf32, #tpu.memory_space<vmem>>, vector<1x16x128xf32>
      %139 = vector.shape_cast %138 : vector<1x16x128xf32> to vector<16x128xf32>
      %140 = vector.shape_cast %115 : vector<16x128xf32> to vector<1x16x128xf32>
      tpu.vector_store %arg7[%c6_76, %c0_77, %c0_78], %140 {strides = array<i32>} : memref<8x16x128xf32, #tpu.memory_space<vmem>>, vector<1x16x128xf32>,
      %c7_79 = arith.constant 7 : index
      %c0_80 = arith.constant 0 : index
      %c0_81 = arith.constant 0 : index
      %141 = vector.load %arg7[%c7_79, %c0_80, %c0_81] : memref<8x16x128xf32, #tpu.memory_space<vmem>>, vector<1x16x128xf32>
      %142 = vector.shape_cast %141 : vector<1x16x128xf32> to vector<16x128xf32>
      %143 = vector.shape_cast %119 : vector<16x128xf32> to vector<1x16x128xf32>
      tpu.vector_store %arg7[%c7_79, %c0_80, %c0_81], %143 {strides = array<i32>} : memref<8x16x128xf32, #tpu.memory_space<vmem>>, vector<1x16x128xf32>,
    } else {
    }
    %c3_i32_20 = arith.constant 3 : i32
    %45 = arith.cmpi eq, %arg2, %c3_i32_20 : i32
    %46 = arith.extui %45 : i1 to i32
    %c0_i32_21 = arith.constant 0 : i32
    %47 = arith.cmpi ne, %46, %c0_i32_21 : i32
    scf.if %47 {
      %c0_22 = arith.constant 0 : index
      %c0_23 = arith.constant 0 : index
      %c0_24 = arith.constant 0 : index
      %48 = vector.load %arg7[%c0_22, %c0_23, %c0_24] : memref<8x16x128xf32, #tpu.memory_space<vmem>>, vector<1x16x128xf32>
      %49 = vector.shape_cast %48 : vector<1x16x128xf32> to vector<16x128xf32>
      %cst = arith.constant dense<0.000000e+00> : vector<16xf32>
      %50 = vector.multi_reduction <add>, %49, %cst [1] : vector<16x128xf32> to vector<16xf32>
      %51 = vector.shape_cast %50 : vector<16xf32> to vector<16x1xf32>
      %cst_25 = arith.constant 2.500000e-03 : f32
      %52 = vector.broadcast %cst_25 : f32 to vector<16x1xf32>
      %53 = arith.mulf %51, %52 : vector<16x1xf32>
      %c0_26 = arith.constant 0 : index
      %c0_27 = arith.constant 0 : index
      %c0_28 = arith.constant 0 : index
      %54 = vector.load %arg6[%c0_26, %c0_27, %c0_28] : memref<1x16x8xf32, #tpu.memory_space<vmem>>, vector<1x16x1xf32>
      %55 = vector.shape_cast %54 : vector<1x16x1xf32> to vector<16x1xf32>
      %56 = vector.shape_cast %53 : vector<16x1xf32> to vector<1x16x1xf32>
      tpu.vector_store %arg6[%c0_26, %c0_27, %c0_28], %56 {strides = array<i32>} : memref<1x16x8xf32, #tpu.memory_space<vmem>>, vector<1x16x1xf32>,
      %c1_29 = arith.constant 1 : index
      %c0_30 = arith.constant 0 : index
      %c0_31 = arith.constant 0 : index
      %57 = vector.load %arg7[%c1_29, %c0_30, %c0_31] : memref<8x16x128xf32, #tpu.memory_space<vmem>>, vector<1x16x128xf32>
      %58 = vector.shape_cast %57 : vector<1x16x128xf32> to vector<16x128xf32>
      %cst_32 = arith.constant dense<0.000000e+00> : vector<16xf32>
      %59 = vector.multi_reduction <add>, %58, %cst_32 [1] : vector<16x128xf32> to vector<16xf32>
      %60 = vector.shape_cast %59 : vector<16xf32> to vector<16x1xf32>
      %cst_33 = arith.constant 2.500000e-03 : f32
      %61 = vector.broadcast %cst_33 : f32 to vector<16x1xf32>
      %62 = arith.mulf %60, %61 : vector<16x1xf32>
      %c0_34 = arith.constant 0 : index
      %c0_35 = arith.constant 0 : index
      %c1_36 = arith.constant 1 : index
      %63 = vector.load %arg6[%c0_34, %c0_35, %c1_36] : memref<1x16x8xf32, #tpu.memory_space<vmem>>, vector<1x16x1xf32>
      %64 = vector.shape_cast %63 : vector<1x16x1xf32> to vector<16x1xf32>
      %65 = vector.shape_cast %62 : vector<16x1xf32> to vector<1x16x1xf32>
      tpu.vector_store %arg6[%c0_34, %c0_35, %c1_36], %65 {strides = array<i32>} : memref<1x16x8xf32, #tpu.memory_space<vmem>>, vector<1x16x1xf32>,
      %c2_37 = arith.constant 2 : index
      %c0_38 = arith.constant 0 : index
      %c0_39 = arith.constant 0 : index
      %66 = vector.load %arg7[%c2_37, %c0_38, %c0_39] : memref<8x16x128xf32, #tpu.memory_space<vmem>>, vector<1x16x128xf32>
      %67 = vector.shape_cast %66 : vector<1x16x128xf32> to vector<16x128xf32>
      %cst_40 = arith.constant dense<0.000000e+00> : vector<16xf32>
      %68 = vector.multi_reduction <add>, %67, %cst_40 [1] : vector<16x128xf32> to vector<16xf32>
      %69 = vector.shape_cast %68 : vector<16xf32> to vector<16x1xf32>
      %cst_41 = arith.constant 2.500000e-03 : f32
      %70 = vector.broadcast %cst_41 : f32 to vector<16x1xf32>
      %71 = arith.mulf %69, %70 : vector<16x1xf32>
      %c0_42 = arith.constant 0 : index
      %c0_43 = arith.constant 0 : index
      %c2_44 = arith.constant 2 : index
      %72 = vector.load %arg6[%c0_42, %c0_43, %c2_44] : memref<1x16x8xf32, #tpu.memory_space<vmem>>, vector<1x16x1xf32>
      %73 = vector.shape_cast %72 : vector<1x16x1xf32> to vector<16x1xf32>
      %74 = vector.shape_cast %71 : vector<16x1xf32> to vector<1x16x1xf32>
      tpu.vector_store %arg6[%c0_42, %c0_43, %c2_44], %74 {strides = array<i32>} : memref<1x16x8xf32, #tpu.memory_space<vmem>>, vector<1x16x1xf32>,
      %c3_45 = arith.constant 3 : index
      %c0_46 = arith.constant 0 : index
      %c0_47 = arith.constant 0 : index
      %75 = vector.load %arg7[%c3_45, %c0_46, %c0_47] : memref<8x16x128xf32, #tpu.memory_space<vmem>>, vector<1x16x128xf32>
      %76 = vector.shape_cast %75 : vector<1x16x128xf32> to vector<16x128xf32>
      %cst_48 = arith.constant dense<0.000000e+00> : vector<16xf32>
      %77 = vector.multi_reduction <add>, %76, %cst_48 [1] : vector<16x128xf32> to vector<16xf32>
      %78 = vector.shape_cast %77 : vector<16xf32> to vector<16x1xf32>
      %cst_49 = arith.constant 2.500000e-03 : f32
      %79 = vector.broadcast %cst_49 : f32 to vector<16x1xf32>
      %80 = arith.mulf %78, %79 : vector<16x1xf32>
      %c0_50 = arith.constant 0 : index
      %c0_51 = arith.constant 0 : index
      %c3_52 = arith.constant 3 : index
      %81 = vector.load %arg6[%c0_50, %c0_51, %c3_52] : memref<1x16x8xf32, #tpu.memory_space<vmem>>, vector<1x16x1xf32>
      %82 = vector.shape_cast %81 : vector<1x16x1xf32> to vector<16x1xf32>
      %83 = vector.shape_cast %80 : vector<16x1xf32> to vector<1x16x1xf32>
      tpu.vector_store %arg6[%c0_50, %c0_51, %c3_52], %83 {strides = array<i32>} : memref<1x16x8xf32, #tpu.memory_space<vmem>>, vector<1x16x1xf32>,
      %c4_53 = arith.constant 4 : index
      %c0_54 = arith.constant 0 : index
      %c0_55 = arith.constant 0 : index
      %84 = vector.load %arg7[%c4_53, %c0_54, %c0_55] : memref<8x16x128xf32, #tpu.memory_space<vmem>>, vector<1x16x128xf32>
      %85 = vector.shape_cast %84 : vector<1x16x128xf32> to vector<16x128xf32>
      %cst_56 = arith.constant dense<0.000000e+00> : vector<16xf32>
      %86 = vector.multi_reduction <add>, %85, %cst_56 [1] : vector<16x128xf32> to vector<16xf32>
      %87 = vector.shape_cast %86 : vector<16xf32> to vector<16x1xf32>
      %cst_57 = arith.constant 2.500000e-03 : f32
      %88 = vector.broadcast %cst_57 : f32 to vector<16x1xf32>
      %89 = arith.mulf %87, %88 : vector<16x1xf32>
      %c0_58 = arith.constant 0 : index
      %c0_59 = arith.constant 0 : index
      %c4_60 = arith.constant 4 : index
      %90 = vector.load %arg6[%c0_58, %c0_59, %c4_60] : memref<1x16x8xf32, #tpu.memory_space<vmem>>, vector<1x16x1xf32>
      %91 = vector.shape_cast %90 : vector<1x16x1xf32> to vector<16x1xf32>
      %92 = vector.shape_cast %89 : vector<16x1xf32> to vector<1x16x1xf32>
      tpu.vector_store %arg6[%c0_58, %c0_59, %c4_60], %92 {strides = array<i32>} : memref<1x16x8xf32, #tpu.memory_space<vmem>>, vector<1x16x1xf32>,
      %c5_61 = arith.constant 5 : index
      %c0_62 = arith.constant 0 : index
      %c0_63 = arith.constant 0 : index
      %93 = vector.load %arg7[%c5_61, %c0_62, %c0_63] : memref<8x16x128xf32, #tpu.memory_space<vmem>>, vector<1x16x128xf32>
      %94 = vector.shape_cast %93 : vector<1x16x128xf32> to vector<16x128xf32>
      %cst_64 = arith.constant dense<0.000000e+00> : vector<16xf32>
      %95 = vector.multi_reduction <add>, %94, %cst_64 [1] : vector<16x128xf32> to vector<16xf32>
      %96 = vector.shape_cast %95 : vector<16xf32> to vector<16x1xf32>
      %cst_65 = arith.constant 2.500000e-03 : f32
      %97 = vector.broadcast %cst_65 : f32 to vector<16x1xf32>
      %98 = arith.mulf %96, %97 : vector<16x1xf32>
      %c0_66 = arith.constant 0 : index
      %c0_67 = arith.constant 0 : index
      %c5_68 = arith.constant 5 : index
      %99 = vector.load %arg6[%c0_66, %c0_67, %c5_68] : memref<1x16x8xf32, #tpu.memory_space<vmem>>, vector<1x16x1xf32>
      %100 = vector.shape_cast %99 : vector<1x16x1xf32> to vector<16x1xf32>
      %101 = vector.shape_cast %98 : vector<16x1xf32> to vector<1x16x1xf32>
      tpu.vector_store %arg6[%c0_66, %c0_67, %c5_68], %101 {strides = array<i32>} : memref<1x16x8xf32, #tpu.memory_space<vmem>>, vector<1x16x1xf32>,
      %c6_69 = arith.constant 6 : index
      %c0_70 = arith.constant 0 : index
      %c0_71 = arith.constant 0 : index
      %102 = vector.load %arg7[%c6_69, %c0_70, %c0_71] : memref<8x16x128xf32, #tpu.memory_space<vmem>>, vector<1x16x128xf32>
      %103 = vector.shape_cast %102 : vector<1x16x128xf32> to vector<16x128xf32>
      %cst_72 = arith.constant dense<0.000000e+00> : vector<16xf32>
      %104 = vector.multi_reduction <add>, %103, %cst_72 [1] : vector<16x128xf32> to vector<16xf32>
      %105 = vector.shape_cast %104 : vector<16xf32> to vector<16x1xf32>
      %cst_73 = arith.constant 2.500000e-03 : f32
      %106 = vector.broadcast %cst_73 : f32 to vector<16x1xf32>
      %107 = arith.mulf %105, %106 : vector<16x1xf32>
      %c0_74 = arith.constant 0 : index
      %c0_75 = arith.constant 0 : index
      %c6_76 = arith.constant 6 : index
      %108 = vector.load %arg6[%c0_74, %c0_75, %c6_76] : memref<1x16x8xf32, #tpu.memory_space<vmem>>, vector<1x16x1xf32>
      %109 = vector.shape_cast %108 : vector<1x16x1xf32> to vector<16x1xf32>
      %110 = vector.shape_cast %107 : vector<16x1xf32> to vector<1x16x1xf32>
      tpu.vector_store %arg6[%c0_74, %c0_75, %c6_76], %110 {strides = array<i32>} : memref<1x16x8xf32, #tpu.memory_space<vmem>>, vector<1x16x1xf32>,
      %c7_77 = arith.constant 7 : index
      %c0_78 = arith.constant 0 : index
      %c0_79 = arith.constant 0 : index
      %111 = vector.load %arg7[%c7_77, %c0_78, %c0_79] : memref<8x16x128xf32, #tpu.memory_space<vmem>>, vector<1x16x128xf32>
      %112 = vector.shape_cast %111 : vector<1x16x128xf32> to vector<16x128xf32>
      %cst_80 = arith.constant dense<0.000000e+00> : vector<16xf32>
      %113 = vector.multi_reduction <add>, %112, %cst_80 [1] : vector<16x128xf32> to vector<16xf32>
      %114 = vector.shape_cast %113 : vector<16xf32> to vector<16x1xf32>
      %cst_81 = arith.constant 2.500000e-03 : f32
      %115 = vector.broadcast %cst_81 : f32 to vector<16x1xf32>
      %116 = arith.mulf %114, %115 : vector<16x1xf32>
      %c0_82 = arith.constant 0 : index
      %c0_83 = arith.constant 0 : index
      %c7_84 = arith.constant 7 : index
      %117 = vector.load %arg6[%c0_82, %c0_83, %c7_84] : memref<1x16x8xf32, #tpu.memory_space<vmem>>, vector<1x16x1xf32>
      %118 = vector.shape_cast %117 : vector<1x16x1xf32> to vector<16x1xf32>
      %119 = vector.shape_cast %116 : vector<16x1xf32> to vector<1x16x1xf32>
      tpu.vector_store %arg6[%c0_82, %c0_83, %c7_84], %119 {strides = array<i32>} : memref<1x16x8xf32, #tpu.memory_space<vmem>>, vector<1x16x1xf32>,
    } else {
    }
    return
  }
  func.func @transform_0(%arg0: i32, %arg1: i32, %arg2: i32) -> (i32, i32, i32) {
    %c0_i32 = arith.constant 0 : i32
    %c0_i32_0 = arith.constant 0 : i32
    return %arg0, %c0_i32, %arg2 : i32, i32, i32
  }
  func.func @transform_1(%arg0: i32, %arg1: i32, %arg2: i32) -> (i32, i32) {
    %c0_i32 = arith.constant 0 : i32
    %c0_i32_0 = arith.constant 0 : i32
    return %arg1, %c0_i32 : i32, i32
  }
  func.func @transform_2(%arg0: i32, %arg1: i32, %arg2: i32) -> (i32, i32) {
    %c0_i32 = arith.constant 0 : i32
    %c0_i32_0 = arith.constant 0 : i32
    return %arg1, %c0_i32 : i32, i32
  }
  func.func @transform_3(%arg0: i32, %arg1: i32, %arg2: i32) -> (i32, i32, i32) {
    %c0_i32 = arith.constant 0 : i32
    %c0_i32_0 = arith.constant 0 : i32
    return %arg0, %arg1, %c0_i32 : i32, i32, i32
  }
}

</mosaic_0001>

<bundles_post_ra>
// kernel: tpu_custom_call.1
= control target key start
LH: loop header
LB: loop body
LE: loop exit
PB: predicated region body
PF: predicated region fallthrough
CT: control target
= control target key end

     0   :  { %s1075_s12 = smov 0   ;;  %s1077_s13 = smov 0   ;;  %s1341_s0 = inlined_call_operand.vmem [shape: f32[2,4,400], index: 0, kind: input, shape index: {}]   ;;  %s1342_s1 = inlined_call_operand.vmem [shape: f32[16,4], index: 1, kind: input, shape index: {}]   ;;  %s1343_s2 = inlined_call_operand.vmem [shape: f32[16,8], index: 2, kind: input, shape index: {}]   ;;  %s1344_s3 = inlined_call_operand.vmem [shape: f32[2,16,8], index: 3, kind: output, shape index: {}]  }
   0x1   :  { %s1079_s14 = smov 0   ;;  %s1081_s15 = smov 0  }
   0x2   :  { %s1083_s16 = smov 0  }
   0x3 LB: > { %s25_s17 = sadd.s32 1, %s1034_s14  ;;  %s32_s18 = sadd.s32 1, %s1038_s15  ;;  %s1042_s16 = sphi %s1083_s16, %s13_s16   ;;  %s1038_s15 = sphi %s1081_s15, %s1348_s15   ;;  %s1034_s14 = sphi %s1079_s14, %s1347_s14   ;;  %s1030_s13 = sphi %s1077_s13, %s1346_s13   ;;  %s1026_s12 = sphi %s1075_s12, %s1345_s12  }
   0x4   : > { %p26_p0 = scmp.ge.s32.totalorder %s25_s17, 4  ;;  %p884_p1 = scmp.ge.s32.totalorder %s1042_s16, 1 }
   0x5   : > { %p185_p2 = scmp.lt.s32.totalorder %s1042_s16, 9 }
   0x6   : > { %s1350_s17 = smov (%p26_p0, %s25_s17), 0  ;;  %s1352_s18 = smov (!%p26_p0, %s32_s18), %s1038_s15 }
   0x7   : > { %p186_p3 = pnand %p884_p1, %p185_p2  ;;  %p34_p4 = scmp.ge.s32.totalorder %s1352_s18, 2 }
   0x8   : > { %p226_p5 = scmp.lt.s32.totalorder (!%p186_p3), %s1030_s13, 1  ;;  %p228_p6 = scmp.lt.s32.totalorder (!%p186_p3), %s1026_s12, 3 }
   0x9   : > { %s1354_s18 = smov (%p34_p4, %s1352_s18), 0  ;;  %189 = sbr.rel (%p186_p3) target bundleno = 416 (0x1a0), region = 32 }
   0xa   : > { %p889_p7 = scmp.ne.s32.totalorder (!%p186_p3), %s1026_s12, 0 }
  0x10   : > { %s1356_s13 = smov (!%p226_p5, %s1030_s13), 1  ;;  %259 = sbr.rel (%p889_p7) target bundleno = 27 (0x1b), region = 36 }
  0x11   : > { %s229_s19 = scalar_select %p228_p6, %s1026_s12, 3 }
  0x12   : > { %s885_s20 = sshll.u32 %s1356_s13, 2  ;;  %s934_s21 = sshll.u32 %s1356_s13, 4  ;;  %v1044_v0 = vmov (!%p889_p7), 0.0  }
  0x13   : > { %s231_s22 = sadd.s32 %s885_s20, %s229_s19  ;;  %s1112_s25 = scalar_lea.vmem %s1344_s3, %s934_s21  ;;  %260 = vst [vmem:[#allocation2] sm:$0xff] (!%p889_p7), %v1044_v0  ;;  %261 = vst [vmem:[#allocation2 + $0x8] sm:$0xff] (!%p889_p7), %v1044_v0 }
  0x14   : > { %s886_s26 = sshll.u32 %s231_s22, 2  ;;  %262 = vst [vmem:[#allocation2 + $0x10] sm:$0xff] (!%p889_p7), %v1044_v0  ;;  %263 = vst [vmem:[#allocation2 + $0x18] sm:$0xff] (!%p889_p7), %v1044_v0 }
  0x15   : > { %s1117_s29 = scalar_lea.vmem %s1341_s0, %s886_s26  ;;  %264 = vst [vmem:[#allocation2 + $0x20] sm:$0xff] (!%p889_p7), %v1044_v0  ;;  %265 = vst [vmem:[#allocation2 + $0x28] sm:$0xff] (!%p889_p7), %v1044_v0 }
  0x16   : > { %266 = vst [vmem:[#allocation2 + $0x30] sm:$0xff] (!%p889_p7), %v1044_v0  ;;  %267 = vst [vmem:[#allocation2 + $0x38] sm:$0xff] (!%p889_p7), %v1044_v0 }
  0x17   : > { %268 = vst [vmem:[#allocation2 + $0x40] sm:$0xff] %v1044_v0  ;;  %269 = vst [vmem:[#allocation2 + $0x48] sm:$0xff] %v1044_v0 }
  0x18   : > { %270 = vst [vmem:[#allocation2 + $0x50] sm:$0xff] %v1044_v0  ;;  %271 = vst [vmem:[#allocation2 + $0x58] sm:$0xff] %v1044_v0 }
  0x19   : > { %272 = vst [vmem:[#allocation2 + $0x60] sm:$0xff] %v1044_v0  ;;  %273 = vst [vmem:[#allocation2 + $0x68] sm:$0xff] %v1044_v0 }
  0x1a   : > { %274 = vst [vmem:[#allocation2 + $0x70] sm:$0xff] %v1044_v0  ;;  %275 = vst [vmem:[#allocation2 + $0x78] sm:$0xff] %v1044_v0 }
  0x1b PF: > { %v276_v1 = vld [vmem:[%s1342_s1] sm:$0xff]  ;;  %v1045_v2 = vmov 1   ;;  %v1046_v3 = vmov 0   ;;  %v277_v4 = vld [vmem:[%s1342_s1 + $0x8] sm:$0xff]  ;;  %v1047_v5 = vmov 2   ;;  %v1048_v6 = vmov 3  }
  0x1c   : > { %987 = vset.pattern.permute.xlu1 %v1045_v2  ;;  %986 = vset.pattern.permute.xlu0 %v1046_v3  ;;  %v312_v7 = vld [vmem:[%s1343_s2] sm:$0xff]  ;;  %v313_v8 = vld [vmem:[%s1343_s2 + $0x8] sm:$0xff]  ;;  %v1049_v9 = vmov 4   ;;  %v1050_v10 = vmov 5   ;;  %v1051_v11 = vmov 7   ;;  %v1052_v12 = vmov 6  }
  0x1d   : > { %289 = vperm.xlu1 %987, %v276_v1   ;;  %280 = vperm.xlu0 %986, %v276_v1   ;;  %p890_p8 = scmp.ge.s32.totalorder %s1026_s12, 3 }
  0x1e   : > { %v891_v37 = vld [vmem:[%s1117_s29] ss:$0 sm:$0xff] (!%p890_p8)  ;;  %v892_v38 = vld [vmem:[%s1117_s29 + $0x1] ss:$0 sm:$0xff] (!%p890_p8)  ;;  %v893_v41 = vld [vmem:[%s1117_s29 + $0x2] ss:$0 sm:$0xff] (!%p890_p8) }
  0x1f   : > { %v894_v42 = vld [vmem:[%s1117_s29 + $0x3] ss:$0 sm:$0xff] (!%p890_p8)  ;;  %v385_v56 = vld [vmem:[#allocation2 + $0x8] sm:$0xff] (!%p890_p8)  ;;  %v387_v57 = vld [vmem:[#allocation2 + $0x10] sm:$0xff] (!%p890_p8)  ;;  %v1053_v59 = vmov (!%p890_p8), 0.0  }
  0x20   : > { %v384_v53 = vld [vmem:[#allocation2] sm:$0xff] (!%p890_p8)  ;;  %v388_v58 = vld [vmem:[#allocation2 + $0x18] sm:$0xff] (!%p890_p8) }
  0x21   : > { %293 = vperm.xlu1 %987, %v277_v4   ;;  %285 = vperm.xlu0 %986, %v277_v4   ;;  %v390_v0 = vld [vmem:[#allocation2 + $0x20] sm:$0xff] (!%p890_p8) }
  0x25   : > { %988 = vset.pattern.permute.xlu1 %v1047_v5  ;;  %990 = vset.pattern.permute.xlu0 %v1048_v6 }
  0x26   : > { %301 = vperm.xlu1 %988, %v277_v4   ;;  %309 = vperm.xlu0 %990, %v277_v4  }
  0x2a   : > { %989 = vset.pattern.permute.xlu1 %v1048_v6  ;;  %992 = vset.pattern.permute.xlu0 %v1045_v2 }
  0x2b   : > { %305 = vperm.xlu1 %989, %v276_v1   ;;  %325 = vperm.xlu0 %992, %v312_v7  }
  0x2f   : > { %991 = vset.pattern.permute.xlu1 %v1046_v3  ;;  %993 = vset.pattern.permute.xlu0 %v1047_v5 }
  0x30   : > { %316 = vperm.xlu1 %991, %v312_v7   ;;  %297 = vperm.xlu0 %993, %v276_v1  }
  0x34   : > { %321 = vperm.xlu1 %991, %v313_v8   ;;  %337 = vperm.xlu0 %993, %v313_v8  }
  0x38   : > { %994 = vset.pattern.permute.xlu1 %v1045_v2  ;;  %997 = vset.pattern.permute.xlu0 %v1049_v9 }
  0x39   : > { %329 = vperm.xlu1 %994, %v313_v8   ;;  %349 = vperm.xlu0 %997, %v312_v7  }
  0x3d   : > { %995 = vset.pattern.permute.xlu1 %v1047_v5  ;;  %1000 = vset.pattern.permute.xlu0 %v1050_v10  ;;  %v391_v5 = vld [vmem:[#allocation2 + $0x28] sm:$0xff] (!%p890_p8) }
  0x3e   : > { %333 = vperm.xlu1 %995, %v312_v7   ;;  %361 = vperm.xlu0 %1000, %v313_v8  }
  0x42   : > { %996 = vset.pattern.permute.xlu1 %v1048_v6  ;;  %1002 = vset.pattern.permute.xlu0 %v1051_v11  ;;  %v393_v6 = vld [vmem:[#allocation2 + $0x30] sm:$0xff] (!%p890_p8) }
  0x43   : > { %341 = vperm.xlu1 %996, %v312_v7   ;;  %373 = vperm.xlu0 %1002, %v312_v7  }
  0x47   : > { %345 = vperm.xlu1 %996, %v313_v8  }
  0x4b   : > { %998 = vset.pattern.permute.xlu1 %v1049_v9 }
  0x4c   : > { %353 = vperm.xlu1 %998, %v313_v8  }
  0x50   : > { %999 = vset.pattern.permute.xlu1 %v1050_v10 }
  0x51   : > { %357 = vperm.xlu1 %999, %v312_v7  }
  0x55   : > { %1001 = vset.pattern.permute.xlu1 %v1052_v12  ;;  %v396_v12 = vld [vmem:[#allocation2 + $0x40] sm:$0xff] (!%p890_p8) }
  0x56   : > { %365 = vperm.xlu1 %1001, %v312_v7   ;;  %v394_v7 = vld [vmem:[#allocation2 + $0x38] sm:$0xff] (!%p890_p8) }
  0x5a   : > { %369 = vperm.xlu1 %1001, %v313_v8  }
  0x5e   : > { %1003 = vset.pattern.permute.xlu1 %v1051_v11 }
  0x5f   : > { %377 = vperm.xlu1 %1003, %v313_v8  }
  0x9c   : > { %v1132_v13 = vpop.permute.xlu1 %289  ;;  %v1134_v14 = vpop.permute.xlu0 %280 }
  0x9d   : > { %v412_v39 = vmul.f32 (!%p890_p8), %v891_v37, %v1134_v14  ;;  %v419_v40 = vmul.f32 (!%p890_p8), %v892_v38, %v1132_v13 }
  0x9f   : > { %v421_v47 = vadd.f32 (!%p890_p8), %v419_v40, %v412_v39 }
  0xa0   : > { %v1136_v15 = vpop.permute.xlu1 %293  ;;  %v1138_v16 = vpop.permute.xlu0 %285 }
  0xa1   : > { %v413_v43 = vmul.f32 (!%p890_p8), %v891_v37, %v1138_v16  ;;  %v420_v44 = vmul.f32 (!%p890_p8), %v892_v38, %v1136_v15 }
  0xa3   : > { %v422_v49 = vadd.f32 (!%p890_p8), %v420_v44, %v413_v43  ;;  %v400_v43 = vld [vmem:[#allocation2 + $0x58] sm:$0xff] (!%p890_p8) }
  0xa5   : > { %v1140_v17 = vpop.permute.xlu1 %301  ;;  %v1142_v18 = vpop.permute.xlu0 %309 }
  0xa6   : > { %v429_v46 = vmul.f32 (!%p890_p8), %v893_v41, %v1140_v17  ;;  %v438_v50 = vmul.f32 (!%p890_p8), %v894_v42, %v1142_v18 }
  0xa8   : > { %v431_v52 = vadd.f32 (!%p890_p8), %v429_v46, %v422_v49 }
  0xaa   : > { %v1144_v19 = vpop.permute.xlu1 %305  ;;  %v1146_v20 = vpop.permute.xlu0 %325  ;;  %v1195_v55 = vadd.f32 (!%p890_p8), %v438_v50, %v431_v52 }
  0xab   : > { %v437_v48 = vmul.f32 (!%p890_p8), %v894_v42, %v1144_v19  ;;  %v399_v42 = vld [vmem:[#allocation2 + $0x50] sm:$0xff] (!%p890_p8) }
  0xaf   : > { %v1148_v21 = vpop.permute.xlu1 %316  ;;  %v1150_v22 = vpop.permute.xlu0 %297 }
  0xb0   : > { %v428_v45 = vmul.f32 (!%p890_p8), %v893_v41, %v1150_v22  ;;  %v397_v41 = vld [vmem:[#allocation2 + $0x48] sm:$0xff] (!%p890_p8) }
  0xb2   : > { %v430_v51 = vadd.f32 (!%p890_p8), %v428_v45, %v421_v47 }
  0xb3   : > { %v1152_v23 = vpop.permute.xlu1 %321  ;;  %v1154_v24 = vpop.permute.xlu0 %337 }
  0xb4   : > { %v1193_v54 = vadd.f32 (!%p890_p8), %v437_v48, %v430_v51  ;;  %vm442_vm1 = vcmp.lt.f32.partialorder (!%p890_p8), %v1195_v55, %v1152_v23  ;;  %vm458_vm5 = vcmp.lt.f32.partialorder (!%p890_p8), %v1195_v55, %v1154_v24  ;;  %v402_v48 = vld [vmem:[#allocation2 + $0x60] sm:$0xff] (!%p890_p8) }
  0xb5   : > { %v896_v61 = vsel (!%p890_p8), %vm442_vm1, 1.0, %v1053_v59  ;;  %v900_v9 = vsel (!%p890_p8), %vm458_vm5, 1.0, %v1053_v59 }
  0xb6   : > { %vm441_vm0 = vcmp.lt.f32.partialorder (!%p890_p8), %v1193_v54, %v1148_v21  ;;  %vm449_vm2 = vcmp.lt.f32.partialorder (!%p890_p8), %v1193_v54, %v1146_v20  ;;  %v448_v2 = vadd.f32 (!%p890_p8), %v896_v61, %v385_v56  ;;  %v464_v38 = vadd.f32 (!%p890_p8), %v900_v9, %v391_v5  ;;  %v405_v56 = vld [vmem:[#allocation2 + $0x70] sm:$0xff] (!%p890_p8) }
  0xb7   : > { %v895_v60 = vsel (!%p890_p8), %vm441_vm0, 1.0, %v1053_v59  ;;  %v897_v62 = vsel (!%p890_p8), %vm449_vm2, 1.0, %v1053_v59 }
  0xb8   : > { %v1156_v25 = vpop.permute.xlu1 %329  ;;  %v1158_v26 = vpop.permute.xlu0 %349  ;;  %v447_v1 = vadd.f32 (!%p890_p8), %v895_v60, %v384_v53  ;;  %v455_v3 = vadd.f32 (!%p890_p8), %v897_v62, %v387_v57  ;;  %506 = vst [vmem:[#allocation2 + $0x8] sm:$0xff] (!%p890_p8), %v448_v2  ;;  %510 = vst [vmem:[#allocation2 + $0x28] sm:$0xff] (!%p890_p8), %v464_v38  ;;  %v403_v53 = vld [vmem:[#allocation2 + $0x68] sm:$0xff] (!%p890_p8)  ;;  %v406_v57 = vld [vmem:[#allocation2 + $0x78] sm:$0xff] (!%p890_p8) }
  0xb9   : > { %vm450_vm3 = vcmp.lt.f32.partialorder (!%p890_p8), %v1195_v55, %v1156_v25  ;;  %vm473_vm8 = vcmp.lt.f32.partialorder (!%p890_p8), %v1193_v54, %v1158_v26 }
  0xba   : > { %v898_v63 = vsel (!%p890_p8), %vm450_vm3, 1.0, %v1053_v59  ;;  %505 = vst [vmem:[#allocation2] sm:$0xff] (!%p890_p8), %v447_v1  ;;  %507 = vst [vmem:[#allocation2 + $0x10] sm:$0xff] (!%p890_p8), %v455_v3  ;;  %v903_v44 = vsel (!%p890_p8), %vm473_vm8, 1.0, %v1053_v59 }
  0xbb   : > { %v456_v4 = vadd.f32 (!%p890_p8), %v898_v63, %v388_v58  ;;  %v479_v49 = vadd.f32 (!%p890_p8), %v903_v44, %v396_v12 }
  0xbd   : > { %v1160_v27 = vpop.permute.xlu1 %333  ;;  %v1162_v28 = vpop.permute.xlu0 %361  ;;  %508 = vst [vmem:[#allocation2 + $0x18] sm:$0xff] (!%p890_p8), %v456_v4  ;;  %513 = vst [vmem:[#allocation2 + $0x40] sm:$0xff] (!%p890_p8), %v479_v49 }
  0xbe   : > { %vm457_vm4 = vcmp.lt.f32.partialorder (!%p890_p8), %v1193_v54, %v1160_v27  ;;  %vm482_vm11 = vcmp.lt.f32.partialorder (!%p890_p8), %v1195_v55, %v1162_v28 }
  0xbf   : > { %v899_v8 = vsel (!%p890_p8), %vm457_vm4, 1.0, %v1053_v59  ;;  %v906_v47 = vsel (!%p890_p8), %vm482_vm11, 1.0, %v1053_v59 }
  0xc0   : > { %v463_v37 = vadd.f32 (!%p890_p8), %v899_v8, %v390_v0  ;;  %v488_v52 = vadd.f32 (!%p890_p8), %v906_v47, %v400_v43 }
  0xc2   : > { %v1164_v29 = vpop.permute.xlu1 %341  ;;  %v1166_v30 = vpop.permute.xlu0 %373  ;;  %509 = vst [vmem:[#allocation2 + $0x20] sm:$0xff] (!%p890_p8), %v463_v37  ;;  %516 = vst [vmem:[#allocation2 + $0x58] sm:$0xff] (!%p890_p8), %v488_v52 }
  0xc3   : > { %vm465_vm6 = vcmp.lt.f32.partialorder (!%p890_p8), %v1193_v54, %v1164_v29  ;;  %vm497_vm14 = vcmp.lt.f32.partialorder (!%p890_p8), %v1193_v54, %v1166_v30 }
  0xc4   : > { %v901_v10 = vsel (!%p890_p8), %vm465_vm6, 1.0, %v1053_v59  ;;  %v909_v61 = vsel (!%p890_p8), %vm497_vm14, 1.0, %v1053_v59 }
  0xc5   : > { %v471_v39 = vadd.f32 (!%p890_p8), %v901_v10, %v393_v6  ;;  %v503_v1 = vadd.f32 (!%p890_p8), %v909_v61, %v405_v56 }
  0xc6   : > { %v1168_v31 = vpop.permute.xlu1 %345 }
  0xc7   : > { %vm466_vm7 = vcmp.lt.f32.partialorder (!%p890_p8), %v1195_v55, %v1168_v31  ;;  %511 = vst [vmem:[#allocation2 + $0x30] sm:$0xff] (!%p890_p8), %v471_v39  ;;  %519 = vst [vmem:[#allocation2 + $0x70] sm:$0xff] (!%p890_p8), %v503_v1 }
  0xc8   : > { %v902_v11 = vsel (!%p890_p8), %vm466_vm7, 1.0, %v1053_v59 }
  0xc9   : > { %v472_v40 = vadd.f32 (!%p890_p8), %v902_v11, %v394_v7 }
  0xcb   : > { %v1170_v32 = vpop.permute.xlu1 %353  ;;  %512 = vst [vmem:[#allocation2 + $0x38] sm:$0xff] (!%p890_p8), %v472_v40 }
  0xcc   : > { %vm474_vm9 = vcmp.lt.f32.partialorder (!%p890_p8), %v1195_v55, %v1170_v32 }
  0xcd   : > { %v904_v45 = vsel (!%p890_p8), %vm474_vm9, 1.0, %v1053_v59 }
  0xce   : > { %v480_v50 = vadd.f32 (!%p890_p8), %v904_v45, %v397_v41 }
  0xd0   : > { %v1172_v33 = vpop.permute.xlu1 %357  ;;  %514 = vst [vmem:[#allocation2 + $0x48] sm:$0xff] (!%p890_p8), %v480_v50 }
  0xd1   : > { %vm481_vm10 = vcmp.lt.f32.partialorder (!%p890_p8), %v1193_v54, %v1172_v33 }
  0xd2   : > { %v905_v46 = vsel (!%p890_p8), %vm481_vm10, 1.0, %v1053_v59 }
  0xd3   : > { %v487_v51 = vadd.f32 (!%p890_p8), %v905_v46, %v399_v42 }
  0xd5   : > { %v1174_v34 = vpop.permute.xlu1 %365  ;;  %515 = vst [vmem:[#allocation2 + $0x50] sm:$0xff] (!%p890_p8), %v487_v51 }
  0xd6   : > { %vm489_vm12 = vcmp.lt.f32.partialorder (!%p890_p8), %v1193_v54, %v1174_v34 }
  0xd7   : > { %v907_v58 = vsel (!%p890_p8), %vm489_vm12, 1.0, %v1053_v59 }
  0xd8   : > { %383 = sbr.rel (%p890_p8) target bundleno = 228 (0xe4), region = 40  ;;  %v495_v63 = vadd.f32 (!%p890_p8), %v907_v58, %v402_v48 }
  0xd9   : > { %v1176_v35 = vpop.permute.xlu1 %369 }
  0xda   : > { %vm490_vm13 = vcmp.lt.f32.partialorder (!%p890_p8), %v1195_v55, %v1176_v35  ;;  %517 = vst [vmem:[#allocation2 + $0x60] sm:$0xff] (!%p890_p8), %v495_v63 }
  0xdb   : > { %v908_v60 = vsel (!%p890_p8), %vm490_vm13, 1.0, %v1053_v59 }
  0xdc   : > { %v496_v0 = vadd.f32 (!%p890_p8), %v908_v60, %v403_v53 }
  0xde   : > { %v1178_v36 = vpop.permute.xlu1 %377  ;;  %518 = vst [vmem:[#allocation2 + $0x68] sm:$0xff] (!%p890_p8), %v496_v0 }
  0xdf   : > { %vm498_vm15 = vcmp.lt.f32.partialorder %v1195_v55, %v1178_v36 }
  0xe0   : > { %v910_v62 = vsel %vm498_vm15, 1.0, %v1053_v59 }
  0xe1   : > { %v504_v2 = vadd.f32 %v910_v62, %v406_v57 }
  0xe3   : > { %520 = vst [vmem:[#allocation2 + $0x78] sm:$0xff] %v504_v2 }
  0xe4 PF: > { %p911_p9 = scmp.ne.s32.totalorder %s1026_s12, 3 }
  0xe5   : > { %v912_v54 = vld [vmem:[%s1117_s29] ss:$0 sm:$0xff] (!%p911_p9)  ;;  %v913_v55 = vld [vmem:[%s1117_s29 + $0x1] ss:$0 sm:$0xff] (!%p911_p9)  ;;  %v582_v3 = vlaneseq (!%p911_p9)  ;;  %v914_v5 = vld [vmem:[%s1117_s29 + $0x2] ss:$0 sm:$0xff] (!%p911_p9) }
  0xe6   : > { %524 = sbr.rel (%p911_p9) target bundleno = 416 (0x1a0), region = 44  ;;  %v553_v59 = vmul.f32 (!%p911_p9), %v912_v54, %v1134_v14  ;;  %v560_v4 = vmul.f32 (!%p911_p9), %v913_v55, %v1132_v13  ;;  %v915_v6 = vld [vmem:[%s1117_s29 + $0x3] ss:$0 sm:$0xff] (!%p911_p9)  ;;  %v554_v7 = vmul.f32 (!%p911_p9), %v912_v54, %v1138_v16  ;;  %v561_v8 = vmul.f32 (!%p911_p9), %v913_v55, %v1136_v15  ;;  %v528_v42 = vld [vmem:[#allocation2 + $0x10] sm:$0xff] (!%p911_p9)  ;;  %v529_v43 = vld [vmem:[#allocation2 + $0x18] sm:$0xff] (!%p911_p9) }
  0xe7   : > { %v569_v9 = vmul.f32 (!%p911_p9), %v914_v5, %v1150_v22  ;;  %v583_v10 = vand.u32 (!%p911_p9), 127, %v582_v3  ;;  %v570_v11 = vmul.f32 (!%p911_p9), %v914_v5, %v1140_v17  ;;  %v578_v37 = vmul.f32 (!%p911_p9), %v915_v6, %v1144_v19  ;;  %v525_v15 = vld [vmem:[#allocation2] sm:$0xff] (!%p911_p9)  ;;  %v526_v44 = vld [vmem:[#allocation2 + $0x8] sm:$0xff] (!%p911_p9)  ;;  %v535_v51 = vld [vmem:[#allocation2 + $0x38] sm:$0xff] (!%p911_p9) }
  0xe8   : > { %v562_v12 = vadd.f32 (!%p911_p9), %v560_v4, %v553_v59  ;;  %v563_v38 = vadd.f32 (!%p911_p9), %v561_v8, %v554_v7  ;;  %v579_v39 = vmul.f32 (!%p911_p9), %v915_v6, %v1142_v18  ;;  %v1054_v17 = vmov (!%p911_p9), 0.0   ;;  %v532_v47 = vld [vmem:[#allocation2 + $0x28] sm:$0xff] (!%p911_p9)  ;;  %v531_v50 = vld [vmem:[#allocation2 + $0x20] sm:$0xff] (!%p911_p9)  ;;  %v541_v60 = vld [vmem:[#allocation2 + $0x58] sm:$0xff] (!%p911_p9) }
  0xe9   : > { %vm584_vm0 = vcmp.lt.s32.totalorder (!%p911_p9), %v583_v10, 16  ;;  %v538_v58 = vld [vmem:[#allocation2 + $0x48] sm:$0xff] (!%p911_p9)  ;;  %v540_v61 = vld [vmem:[#allocation2 + $0x50] sm:$0xff] (!%p911_p9)  ;;  %v543_v54 = vld [vmem:[#allocation2 + $0x60] sm:$0xff] (!%p911_p9) }
  0xea   : > { %v571_v14 = vadd.f32 (!%p911_p9), %v569_v9, %v562_v12  ;;  %v572_v40 = vadd.f32 (!%p911_p9), %v570_v11, %v563_v38  ;;  %v544_v2 = vld [vmem:[#allocation2 + $0x68] sm:$0xff] (!%p911_p9)  ;;  %v546_v3 = vld [vmem:[#allocation2 + $0x70] sm:$0xff] (!%p911_p9) }
  0xec   : > { %v580_v13 = vadd.f32 (!%p911_p9), %v578_v37, %v571_v14  ;;  %v581_v41 = vadd.f32 (!%p911_p9), %v579_v39, %v572_v40 }
  0xee   : > { %v1258_v16 = vsel %vm584_vm0, %v580_v13, inf  ;;  %v1260_v22 = vsel %vm584_vm0, %v581_v41, inf }
  0xef   : > { %vm595_vm1 = vcmp.lt.f32.partialorder %v1258_v16, %v1146_v20  ;;  %vm587_vm2 = vcmp.lt.f32.partialorder %v1258_v16, %v1148_v21  ;;  %vm596_vm3 = vcmp.lt.f32.partialorder %v1260_v22, %v1156_v25  ;;  %vm588_vm4 = vcmp.lt.f32.partialorder %v1260_v22, %v1152_v23  ;;  %v534_v25 = vld [vmem:[#allocation2 + $0x30] sm:$0xff] }
  0xf0   : > { %v918_v18 = vsel %vm595_vm1, 1.0, %v1054_v17  ;;  %v916_v19 = vsel %vm587_vm2, 1.0, %v1054_v17  ;;  %v919_v45 = vsel %vm596_vm3, 1.0, %v1054_v17  ;;  %v917_v46 = vsel %vm588_vm4, 1.0, %v1054_v17 }
  0xf1   : > { %v601_v20 = vadd.f32 %v918_v18, %v528_v42  ;;  %v593_v48 = vadd.f32 %v916_v19, %v525_v15  ;;  %v602_v49 = vadd.f32 %v919_v45, %v529_v43  ;;  %v594_v21 = vadd.f32 %v917_v46, %v526_v44 }
  0xf2   : > { %vm604_vm5 = vcmp.lt.f32.partialorder %v1260_v22, %v1154_v24  ;;  %vm603_vm6 = vcmp.lt.f32.partialorder %v1258_v16, %v1160_v27  ;;  %vm612_vm7 = vcmp.lt.f32.partialorder %v1260_v22, %v1168_v31  ;;  %vm611_vm8 = vcmp.lt.f32.partialorder %v1258_v16, %v1164_v29  ;;  %v537_v29 = vld [vmem:[#allocation2 + $0x40] sm:$0xff] }
  0xf3   : > { %653 = vst [vmem:[#allocation2 + $0x10] sm:$0xff] %v601_v20  ;;  %680 = vadd.xlane.f32.xlu1 %v601_v20  ;;  %651 = vst [vmem:[#allocation2] sm:$0xff] %v593_v48  ;;  %669 = vadd.xlane.f32.xlu0 %v593_v48  ;;  %v921_v23 = vsel %vm604_vm5, 1.0, %v1054_v17  ;;  %v920_v52 = vsel %vm603_vm6, 1.0, %v1054_v17  ;;  %v923_v24 = vsel %vm612_vm7, 1.0, %v1054_v17  ;;  %v922_v27 = vsel %vm611_vm8, 1.0, %v1054_v17 }
  0xf4   : > { %654 = vst [vmem:[#allocation2 + $0x18] sm:$0xff] %v602_v49  ;;  %652 = vst [vmem:[#allocation2 + $0x8] sm:$0xff] %v594_v21  ;;  %v610_v53 = vadd.f32 %v921_v23, %v532_v47  ;;  %v609_v56 = vadd.f32 %v920_v52, %v531_v50  ;;  %v618_v31 = vadd.f32 %v923_v24, %v535_v51  ;;  %vm675_vm1 = vcmask 7168  }
  0xf5   : > { %v617_v57 = vadd.f32 %v922_v27, %v534_v25  ;;  %vm620_vm9 = vcmp.lt.f32.partialorder %v1260_v22, %v1170_v32  ;;  %vm619_vm10 = vcmp.lt.f32.partialorder %v1258_v16, %v1158_v26  ;;  %vm628_vm11 = vcmp.lt.f32.partialorder %v1260_v22, %v1162_v28 }
  0xf6   : > { %vm627_vm12 = vcmp.lt.f32.partialorder %v1258_v16, %v1172_v33  ;;  %656 = vst [vmem:[#allocation2 + $0x28] sm:$0xff] %v610_v53  ;;  %655 = vst [vmem:[#allocation2 + $0x20] sm:$0xff] %v609_v56  ;;  %v925_v62 = vsel %vm620_vm9, 1.0, %v1054_v17  ;;  %v924_v63 = vsel %vm619_vm10, 1.0, %v1054_v17  ;;  %v927_v32 = vsel %vm628_vm11, 1.0, %v1054_v17  ;;  %v547_v33 = vld [vmem:[#allocation2 + $0x78] sm:$0xff] }
  0xf7   : > { %658 = vst [vmem:[#allocation2 + $0x38] sm:$0xff] %v618_v31  ;;  %657 = vst [vmem:[#allocation2 + $0x30] sm:$0xff] %v617_v57  ;;  %v926_v0 = vsel %vm627_vm12, 1.0, %v1054_v17  ;;  %682 = vadd.xlane.f32.xlu1 %v602_v49  ;;  %671 = vadd.xlane.f32.xlu0 %v594_v21  ;;  %v626_v26 = vadd.f32 %v925_v62, %v538_v58  ;;  %v625_v28 = vadd.f32 %v924_v63, %v537_v29  ;;  %vm686_vm2 = vcmask 15368  }
  0xf8   : > { %v634_v1 = vadd.f32 %v927_v32, %v541_v60  ;;  %v633_v55 = vadd.f32 %v926_v0, %v540_v61  ;;  %vm636_vm13 = vcmp.lt.f32.partialorder %v1260_v22, %v1176_v35  ;;  %vm635_vm14 = vcmp.lt.f32.partialorder %v1258_v16, %v1174_v34 }
  0xf9   : > { %vm644_vm15 = vcmp.lt.f32.partialorder %v1260_v22, %v1178_v36  ;;  %660 = vst [vmem:[#allocation2 + $0x48] sm:$0xff] %v626_v26  ;;  %659 = vst [vmem:[#allocation2 + $0x40] sm:$0xff] %v625_v28  ;;  %v929_v59 = vsel %vm636_vm13, 1.0, %v1054_v17  ;;  %v928_v4 = vsel %vm635_vm14, 1.0, %v1054_v17  ;;  %vm643_vm0 = vcmp.lt.f32.partialorder %v1258_v16, %v1166_v30 }
  0xfa   : > { %662 = vst [vmem:[#allocation2 + $0x58] sm:$0xff] %v634_v1  ;;  %v931_v5 = vsel %vm644_vm15, 1.0, %v1054_v17  ;;  %661 = vst [vmem:[#allocation2 + $0x50] sm:$0xff] %v633_v55  ;;  %v642_v35 = vadd.f32 %v929_v59, %v544_v2  ;;  %v641_v6 = vadd.f32 %v928_v4, %v543_v54  ;;  %v930_v7 = vsel %vm643_vm0, 1.0, %v1054_v17 }
  0xfb   : > { %v650_v34 = vadd.f32 %v931_v5, %v547_v33  ;;  %693 = vadd.xlane.f32.xlu1 %v610_v53  ;;  %691 = vadd.xlane.f32.xlu0 %v609_v56  ;;  %v649_v36 = vadd.f32 %v930_v7, %v546_v3  ;;  %vm697_vm3 = vcmask 23568   ;;  %vm708_vm4 = vcmask 31768  }
  0xfc   : > { %664 = vst [vmem:[#allocation2 + $0x68] sm:$0xff] %v642_v35  ;;  %663 = vst [vmem:[#allocation2 + $0x60] sm:$0xff] %v641_v6  ;;  %vm719_vm5 = vcmask 39968   ;;  %vm730_vm6 = vcmask 48168   ;;  %vm741_vm7 = vcmask 56368   ;;  %vm752_vm8 = vcmask 64568  }
  0xfd   : > { %666 = vst [vmem:[#allocation2 + $0x78] sm:$0xff] %v650_v34  ;;  %665 = vst [vmem:[#allocation2 + $0x70] sm:$0xff] %v649_v36 }
  0xff   : > { %704 = vadd.xlane.f32.xlu1 %v618_v31  ;;  %702 = vadd.xlane.f32.xlu0 %v617_v57 }
 0x103   : > { %715 = vadd.xlane.f32.xlu1 %v626_v26  ;;  %713 = vadd.xlane.f32.xlu0 %v625_v28 }
 0x107   : > { %726 = vadd.xlane.f32.xlu1 %v634_v1  ;;  %724 = vadd.xlane.f32.xlu0 %v633_v55 }
 0x10b   : > { %737 = vadd.xlane.f32.xlu1 %v642_v35  ;;  %735 = vadd.xlane.f32.xlu0 %v641_v6 }
 0x10f   : > { %748 = vadd.xlane.f32.xlu1 %v650_v34  ;;  %746 = vadd.xlane.f32.xlu0 %v649_v36 }
 0x180   : > { %v681_v30 = vpop.xlane.xlu1 %680  ;;  %v670_v8 = vpop.xlane.xlu0 %669 }
 0x181   : > { %v684_v9 = vmul.f32 0.0025, %v681_v30  ;;  %v673_v10 = vmul.f32 0.0025, %v670_v8 }
 0x183   : > { %676 = vst.msk [vmem:[%s1112_s25] sm:$0xff] %vm675_vm1, %v673_v10 }
 0x184   : > { %687 = vst.msk [vmem:[%s1112_s25] sm:$0xff] %vm686_vm2, %v684_v9  ;;  %v683_v11 = vpop.xlane.xlu1 %682  ;;  %v672_v12 = vpop.xlane.xlu0 %671 }
 0x185   : > { %v685_v37 = vmul.f32 0.0025, %v683_v11  ;;  %v674_v38 = vmul.f32 0.0025, %v672_v12 }
 0x187   : > { %677 = vst.msk [vmem:[%s1112_s25 + $0x8] sm:$0xff] %vm675_vm1, %v674_v38 }
 0x188   : > { %688 = vst.msk [vmem:[%s1112_s25 + $0x8] sm:$0xff] %vm686_vm2, %v685_v37  ;;  %v694_v39 = vpop.xlane.xlu1 %693  ;;  %v692_v14 = vpop.xlane.xlu0 %691 }
 0x189   : > { %v696_v40 = vmul.f32 0.0025, %v694_v39  ;;  %v695_v13 = vmul.f32 0.0025, %v692_v14 }
 0x18b   : > { %699 = vst.msk [vmem:[%s1112_s25 + $0x8] sm:$0xff] %vm697_vm3, %v696_v40  ;;  %698 = vst.msk [vmem:[%s1112_s25] sm:$0xff] %vm697_vm3, %v695_v13 }
 0x18c   : > { %v705_v41 = vpop.xlane.xlu1 %704  ;;  %v703_v42 = vpop.xlane.xlu0 %702 }
 0x18d   : > { %v707_v16 = vmul.f32 0.0025, %v705_v41  ;;  %v706_v15 = vmul.f32 0.0025, %v703_v42 }
 0x18f   : > { %710 = vst.msk [vmem:[%s1112_s25 + $0x8] sm:$0xff] %vm708_vm4, %v707_v16  ;;  %709 = vst.msk [vmem:[%s1112_s25] sm:$0xff] %vm708_vm4, %v706_v15 }
 0x190   : > { %v716_v43 = vpop.xlane.xlu1 %715  ;;  %v714_v22 = vpop.xlane.xlu0 %713 }
 0x191   : > { %v718_v44 = vmul.f32 0.0025, %v716_v43  ;;  %v717_v17 = vmul.f32 0.0025, %v714_v22 }
 0x193   : > { %721 = vst.msk [vmem:[%s1112_s25 + $0x8] sm:$0xff] %vm719_vm5, %v718_v44  ;;  %720 = vst.msk [vmem:[%s1112_s25] sm:$0xff] %vm719_vm5, %v717_v17 }
 0x194   : > { %v727_v18 = vpop.xlane.xlu1 %726  ;;  %v725_v19 = vpop.xlane.xlu0 %724 }
 0x195   : > { %v729_v45 = vmul.f32 0.0025, %v727_v18  ;;  %v728_v46 = vmul.f32 0.0025, %v725_v19 }
 0x197   : > { %732 = vst.msk [vmem:[%s1112_s25 + $0x8] sm:$0xff] %vm730_vm6, %v729_v45  ;;  %731 = vst.msk [vmem:[%s1112_s25] sm:$0xff] %vm730_vm6, %v728_v46 }
 0x198   : > { %v738_v47 = vpop.xlane.xlu1 %737  ;;  %v736_v20 = vpop.xlane.xlu0 %735 }
 0x199   : > { %v740_v48 = vmul.f32 0.0025, %v738_v47  ;;  %v739_v49 = vmul.f32 0.0025, %v736_v20 }
 0x19b   : > { %743 = vst.msk [vmem:[%s1112_s25 + $0x8] sm:$0xff] %vm741_vm7, %v740_v48  ;;  %742 = vst.msk [vmem:[%s1112_s25] sm:$0xff] %vm741_vm7, %v739_v49 }
 0x19c   : > { %v749_v21 = vpop.xlane.xlu1 %748  ;;  %v747_v50 = vpop.xlane.xlu0 %746 }
 0x19d   : > { %v751_v51 = vmul.f32 0.0025, %v749_v21  ;;  %v750_v25 = vmul.f32 0.0025, %v747_v50 }
 0x19f   : > { %754 = vst.msk [vmem:[%s1112_s25 + $0x8] sm:$0xff] %vm752_vm8, %v751_v51  ;;  %753 = vst.msk [vmem:[%s1112_s25] sm:$0xff] %vm752_vm8, %v750_v25 }
 0x1a0 PF: > { %s13_s16 = sadd.s32 1, %s1042_s16   ;;  %s1345_s12 = smov %s1034_s14 }
 0x1a1   : > { %p10_p10 = scmp.ge.s32.totalorder %s13_s16, 10   ;;  %s1346_s13 = smov %s1038_s15 }
 0x1a2   : > { %s1347_s14 = smov %s1350_s17  ;;  %s1348_s15 = smov %s1354_s18 }
 0x1a3   :  { %12 = sbr.rel (!%p10_p10) target bundleno = 3 (0x3), region = 94 }

</bundles_post_ra>
